<compile_context>
chip_gen: v6e
topology: v6e:2x2x1
jax: 0.10.0
libtpu: 0.0.40
codegen_flags: <defaults>
</compile_context>

<pallas_src>
import functools

import jax
import jax.numpy as jnp
from jax.experimental import pallas as pl
from jax.experimental.pallas import tpu as pltpu


def _round_up(x, m):
    return (x + m - 1) // m * m


# ---------------------------------------------------------------------------
# Kernel 1: one SAGEConv layer, grid = (row tiles i, contraction tiles k).
#   acc[i]   += A[i,k] @ H[k]                      (bf16 MXU, f32 accumulate)
#   out[i]    = relu?( concat([acc[i], H[i]]) @ [Wl;Wr] + b )   at k == last
# ---------------------------------------------------------------------------
def sage_layer_kernel(a_ref, hk_ref, hroot_ref, w_ref, b_ref, out_ref, acc_ref,
                      *, apply_relu):
    k = pl.program_id(1)

    @pl.when(k == 0)
    def _():
        acc_ref[...] = jnp.zeros_like(acc_ref)

    # neighbor-mean aggregation tile (bf16 operands -> f32 accumulator)
    acc_ref[...] += jnp.dot(a_ref[...], hk_ref[...],
                            preferred_element_type=jnp.float32)

    @pl.when(k == pl.num_programs(1) - 1)
    def _():
        agg = acc_ref[...].astype(jnp.bfloat16)
        hcat = jnp.concatenate([agg, hroot_ref[...]], axis=-1)      # [tm, 2*F]
        h = jnp.dot(hcat, w_ref[...], preferred_element_type=jnp.float32)
        h = h + b_ref[...]                                          # bias in f32
        if apply_relu:
            h = jnp.maximum(h, 0.0)
        out_ref[...] = h.astype(out_ref.dtype)


# ---------------------------------------------------------------------------
# Kernel 2: layer 3 + global_mean_pool + final Linear fused.
#   pooled += P[:, i] @ ( concat([agg_i, H[i]]) @ [W3l;W3r] + b3 )   at k == last
#   out     = pooled @ Wlin + blin                                    at (last i, last k)
# pooled accumulates across the row axis -> both grid axes "arbitrary".
# ---------------------------------------------------------------------------
def sage_pool_lin_kernel(a_ref, hk_ref, hroot_ref, p_ref, w_ref, b_ref,
                         wlin_ref, blin_ref, out_ref, acc_ref, pool_ref):
    i = pl.program_id(0)
    k = pl.program_id(1)
    last_i = pl.num_programs(0) - 1
    last_k = pl.num_programs(1) - 1

    @pl.when(jnp.logical_and(i == 0, k == 0))
    def _():
        pool_ref[...] = jnp.zeros_like(pool_ref)

    @pl.when(k == 0)
    def _():
        acc_ref[...] = jnp.zeros_like(acc_ref)

    acc_ref[...] += jnp.dot(a_ref[...], hk_ref[...],
                            preferred_element_type=jnp.float32)

    @pl.when(k == last_k)
    def _():
        agg = acc_ref[...].astype(jnp.bfloat16)
        hcat = jnp.concatenate([agg, hroot_ref[...]], axis=-1)
        h3 = jnp.dot(hcat, w_ref[...], preferred_element_type=jnp.float32) + b_ref[...]
        # no ReLU after conv3 (matches the reference forward)
        pool_ref[...] += jnp.dot(p_ref[...], h3.astype(jnp.bfloat16),
                                 preferred_element_type=jnp.float32)

    @pl.when(jnp.logical_and(i == last_i, k == last_k))
    def _():
        # dropout(p=0.5) is identity at inference; final Linear in f32 (tiny).
        out_ref[...] = (jnp.dot(pool_ref[...], wlin_ref[...],
                                preferred_element_type=jnp.float32) + blin_ref[...])


# ---------------------------------------------------------------------------
# Wrappers
# ---------------------------------------------------------------------------
_VMEM_LIMIT = 32 * 1024 * 1024


def _sage_layer(adj, h, w, b, *, apply_relu, tm, tk):
    n = adj.shape[0]
    f = h.shape[1]
    hout = w.shape[1]
    grid = (n // tm, n // tk)
    flops = 2 * n * n * f + 2 * n * (2 * f) * hout
    bytes_accessed = (adj.size * 2 + 2 * h.size * 2 + w.size * 2
                      + b.size * 4 + n * hout * 2)
    kernel = functools.partial(sage_layer_kernel, apply_relu=apply_relu)
    return pl.pallas_call(
        kernel,
        out_shape=jax.ShapeDtypeStruct((n, hout), jnp.bfloat16),
        grid_spec=pltpu.PrefetchScalarGridSpec(
            num_scalar_prefetch=0,
            grid=grid,
            in_specs=[
                pl.BlockSpec((tm, tk), lambda i, k: (i, k)),        # A tile
                pl.BlockSpec((tk, f), lambda i, k: (k, 0)),         # H rows (aggregation)
                pl.BlockSpec((tm, f), lambda i, k: (i, 0)),         # H rows (root term)
                pl.BlockSpec((2 * f, hout), lambda i, k: (0, 0)),   # stacked [Wl; Wr]
                pl.BlockSpec((1, hout), lambda i, k: (0, 0)),       # bias (f32)
            ],
            out_specs=pl.BlockSpec((tm, hout), lambda i, k: (i, 0)),
            scratch_shapes=[pltpu.VMEM((tm, f), jnp.float32)],
        ),
        compiler_params=pltpu.CompilerParams(
            dimension_semantics=("parallel", "arbitrary"),
            vmem_limit_bytes=_VMEM_LIMIT,
        ),
        cost_estimate=pl.CostEstimate(flops=int(flops), transcendentals=0,
                                      bytes_accessed=int(bytes_accessed)),
    )(adj, h, h, w, b)


def _sage_pool_lin(adj, h, pool, w, b, wlin, blin, *, tm, tk):
    n = adj.shape[0]
    f = h.shape[1]
    hout = w.shape[1]
    gp = pool.shape[0]
    cp = wlin.shape[1]
    grid = (n // tm, n // tk)
    flops = 2 * n * n * f + 2 * n * (2 * f) * hout + 2 * gp * n * hout + 2 * gp * hout * cp
    bytes_accessed = (adj.size * 2 + 2 * h.size * 2 + pool.size * 2
                      + w.size * 2 + wlin.size * 4 + gp * cp * 4)
    return pl.pallas_call(
        sage_pool_lin_kernel,
        out_shape=jax.ShapeDtypeStruct((gp, cp), jnp.float32),
        grid_spec=pltpu.PrefetchScalarGridSpec(
            num_scalar_prefetch=0,
            grid=grid,
            in_specs=[
                pl.BlockSpec((tm, tk), lambda i, k: (i, k)),        # A tile
                pl.BlockSpec((tk, f), lambda i, k: (k, 0)),         # H rows (aggregation)
                pl.BlockSpec((tm, f), lambda i, k: (i, 0)),         # H rows (root term)
                pl.BlockSpec((gp, tm), lambda i, k: (0, i)),        # pooling columns
                pl.BlockSpec((2 * f, hout), lambda i, k: (0, 0)),   # stacked [W3l; W3r]
                pl.BlockSpec((1, hout), lambda i, k: (0, 0)),       # b3
                pl.BlockSpec((f, cp), lambda i, k: (0, 0)),         # Wlin (f32)
                pl.BlockSpec((1, cp), lambda i, k: (0, 0)),         # blin (f32)
            ],
            out_specs=pl.BlockSpec((gp, cp), lambda i, k: (0, 0)),
            scratch_shapes=[pltpu.VMEM((tm, f), jnp.float32),
                            pltpu.VMEM((gp, hout), jnp.float32)],
        ),
        compiler_params=pltpu.CompilerParams(
            # pooled accumulates across the row axis -> must be sequential.
            dimension_semantics=("arbitrary", "arbitrary"),
            vmem_limit_bytes=_VMEM_LIMIT,
        ),
        cost_estimate=pl.CostEstimate(flops=int(flops), transcendentals=0,
                                      bytes_accessed=int(bytes_accessed)),
    )(adj, h, h, pool, w, b, wlin, blin)


def sagenet_forward(x, adj, pool, params, *, tm=128, tk=128):
    """x: [N_pad, F_pad] bf16, adj: [N_pad, N_pad] bf16, pool: [G_pad, N_pad] bf16.
    Returns padded logits [G_pad, C_pad] f32."""
    h = _sage_layer(adj, x, params["w1"], params["b1"], apply_relu=True, tm=tm, tk=tk)
    h = _sage_layer(adj, h, params["w2"], params["b2"], apply_relu=True, tm=tm, tk=tk)
    return _sage_pool_lin(adj, h, pool, params["w3"], params["b3"],
                          params["wlin"], params["blin"], tm=tm, tk=tk)


# ---------------------------------------------------------------------------
# Host-side data / parameter preparation (padding + dense A / P construction)
# ---------------------------------------------------------------------------
def prepare_inputs(x, edge_index, batch, num_graphs, *, tile=128):
    n, f = x.shape
    n_pad = _round_up(max(n, tile), tile)
    f_pad = _round_up(f, 128)
    g_pad = _round_up(max(num_graphs, 8), 8)

    src, dst = edge_index[0], edge_index[1]
    a = jnp.zeros((n_pad, n_pad), jnp.float32).at[dst, src].add(1.0)
    deg = a.sum(axis=1, keepdims=True)
    adj = (a / jnp.maximum(deg, 1.0)).astype(jnp.bfloat16)          # mean aggregation

    p = jnp.zeros((g_pad, n_pad), jnp.float32).at[batch, jnp.arange(n)].set(1.0)
    cnt = p.sum(axis=1, keepdims=True)
    pool = (p / jnp.maximum(cnt, 1.0)).astype(jnp.bfloat16)         # global mean pool

    x_pad = jnp.zeros((n_pad, f_pad), jnp.float32).at[:n, :f].set(x).astype(jnp.bfloat16)
    return x_pad, adj, pool


def init_params(key, num_features, hidden, num_classes):
    """Synthetic parameters, shapes matching the torch module, padded to 128 lanes."""
    f_pad = _round_up(num_features, 128)
    h_pad = _round_up(hidden, 128)
    c_pad = _round_up(num_classes, 128)
    ks = jax.random.split(key, 8)

    def lin(k, fan_in, fan_out):
        bound = 1.0 / jnp.sqrt(fan_in)
        return jax.random.uniform(k, (fan_in, fan_out), jnp.float32, -bound, bound)

    def pad2(w, rows, cols):
        return jnp.zeros((rows, cols), jnp.float32).at[:w.shape[0], :w.shape[1]].set(w)

    def stacked(wl, wr, fin_pad, hout_pad):
        return jnp.concatenate([pad2(wl, fin_pad, hout_pad),
                                pad2(wr, fin_pad, hout_pad)], axis=0).astype(jnp.bfloat16)

    return dict(
        w1=stacked(lin(ks[0], num_features, hidden), lin(ks[1], num_features, hidden),
                   f_pad, h_pad),
        b1=jnp.zeros((1, h_pad), jnp.float32),
        w2=stacked(lin(ks[2], hidden, hidden), lin(ks[3], hidden, hidden), h_pad, h_pad),
        b2=jnp.zeros((1, h_pad), jnp.float32),
        w3=stacked(lin(ks[4], hidden, hidden), lin(ks[5], hidden, hidden), h_pad, h_pad),
        b3=jnp.zeros((1, h_pad), jnp.float32),
        wlin=pad2(lin(ks[6], hidden, num_classes), h_pad, c_pad),
        blin=pad2(jax.random.uniform(ks[7], (1, num_classes), jnp.float32,
                                     -1.0 / jnp.sqrt(hidden), 1.0 / jnp.sqrt(hidden)),
                  1, c_pad),
    )


if __name__ == "__main__":
    key = jax.random.PRNGKey(0)
    k_x, k_e, k_p = jax.random.split(key, 3)

    num_nodes = 200          # pads to 256 -> (2, 2) grid with 128x128 tiles
    num_features = 8
    hidden = 32
    num_classes = 4
    num_graphs = 2
    num_edges = 800
    tile = 128

    x = jax.random.normal(k_x, (num_nodes, num_features), jnp.float32)
    edge_index = jax.random.randint(k_e, (2, num_edges), 0, num_nodes, jnp.int32)
    batch = jnp.concatenate([jnp.zeros(num_nodes // 2, jnp.int32),
                             jnp.ones(num_nodes - num_nodes // 2, jnp.int32)])

    x_pad, adj, pool = prepare_inputs(x, edge_index, batch, num_graphs, tile=tile)
    params = init_params(k_p, num_features, hidden, num_classes)

    fwd = jax.jit(functools.partial(sagenet_forward, tm=tile, tk=tile))
    out_pad = fwd(x_pad, adj, pool, params)            # [G_pad, C_pad] f32, lane-dense
    out = out_pad[:num_graphs, :num_classes]           # slice padding off in the wrapper
    jax.block_until_ready(out)

    assert out.shape == (num_graphs, num_classes) and out.dtype == jnp.float32
    assert bool(jnp.all(jnp.isfinite(out)))
    print("KERNEL_OK")
</pallas_src>

<mosaic_0001>
module attributes {stable_mosaic.version = 11 : i64} {
  func.func @sage_layer_kernel(%arg0: i32, %arg1: i32, %arg2: memref<128x128xbf16, #tpu.memory_space<vmem>>, %arg3: memref<128x128xbf16, #tpu.memory_space<vmem>>, %arg4: memref<128x128xbf16, #tpu.memory_space<vmem>>, %arg5: memref<256x128xbf16, #tpu.memory_space<vmem>>, %arg6: memref<1x128xf32, #tpu.memory_space<vmem>>, %arg7: memref<128x128xbf16, #tpu.memory_space<vmem>>, %arg8: memref<128x128xf32, #tpu.memory_space<vmem>>) attributes {dimension_semantics = [#tpu.dimension_semantics<parallel>, #tpu.dimension_semantics<arbitrary>], iteration_bounds = array<i64: 2, 2>, scalar_prefetch = 0 : i64, scratch_operands = 1 : i64, tpu.core_type = #tpu.core_type<tc>, window_params = [{transform_indices = @transform_0, window_bounds = array<i64: 128, 128>}, {transform_indices = @transform_1, window_bounds = array<i64: 128, 128>}, {transform_indices = @transform_2, window_bounds = array<i64: 128, 128>}, {pipeline_mode = #tpu.pipeline_mode<synchronous>, transform_indices = @transform_3, window_bounds = array<i64: 256, 128>}, {pipeline_mode = #tpu.pipeline_mode<synchronous>, transform_indices = @transform_4, window_bounds = array<i64: 1, 128>}, {transform_indices = @transform_5, window_bounds = array<i64: 128, 128>}]} {
    %c0_i32 = arith.constant 0 : i32
    %0 = arith.cmpi eq, %arg1, %c0_i32 : i32
    %1 = arith.extui %0 : i1 to i32
    %c0_i32_0 = arith.constant 0 : i32
    %2 = arith.cmpi ne, %1, %c0_i32_0 : i32
    scf.if %2 {
      %cst_9 = arith.constant 0.000000e+00 : f32
      %12 = vector.broadcast %cst_9 : f32 to vector<128x128xf32>
      %c0_10 = arith.constant 0 : index
      %c0_11 = arith.constant 0 : index
      %13 = vector.load %arg8[%c0_10, %c0_11] : memref<128x128xf32, #tpu.memory_space<vmem>>, vector<128x128xf32>
      tpu.vector_store %arg8[%c0_10, %c0_11], %12 {strides = array<i32>} : memref<128x128xf32, #tpu.memory_space<vmem>>, vector<128x128xf32>,
    } else {
    }
    %c0 = arith.constant 0 : index
    %c0_1 = arith.constant 0 : index
    %3 = vector.load %arg8[%c0, %c0_1] : memref<128x128xf32, #tpu.memory_space<vmem>>, vector<128x128xf32>
    %c0_2 = arith.constant 0 : index
    %c0_3 = arith.constant 0 : index
    %4 = vector.load %arg2[%c0_2, %c0_3] : memref<128x128xbf16, #tpu.memory_space<vmem>>, vector<128x128xbf16>
    %c0_4 = arith.constant 0 : index
    %c0_5 = arith.constant 0 : index
    %5 = vector.load %arg3[%c0_4, %c0_5] : memref<128x128xbf16, #tpu.memory_space<vmem>>, vector<128x128xbf16>
    %cst = arith.constant dense<0.000000e+00> : vector<128x128xf32>
    %6 = tpu.matmul %4, %5, %cst {dimension_numbers = #tpu.dot_dimension_numbers<[1], [0], [0], [1], [0, 0, 1, 1], [], []>} : vector<128x128xbf16>, vector<128x128xbf16>, vector<128x128xf32> -> vector<128x128xf32>
    %7 = arith.addf %3, %6 : vector<128x128xf32>
    %c0_6 = arith.constant 0 : index
    %c0_7 = arith.constant 0 : index
    %8 = vector.load %arg8[%c0_6, %c0_7] : memref<128x128xf32, #tpu.memory_space<vmem>>, vector<128x128xf32>
    tpu.vector_store %arg8[%c0_6, %c0_7], %7 {strides = array<i32>} : memref<128x128xf32, #tpu.memory_space<vmem>>, vector<128x128xf32>,
    %c1_i32 = arith.constant 1 : i32
    %9 = arith.cmpi eq, %arg1, %c1_i32 : i32
    %10 = arith.extui %9 : i1 to i32
    %c0_i32_8 = arith.constant 0 : i32
    %11 = arith.cmpi ne, %10, %c0_i32_8 : i32
    scf.if %11 {
      %c0_9 = arith.constant 0 : index
      %c0_10 = arith.constant 0 : index
      %12 = vector.load %arg8[%c0_9, %c0_10] : memref<128x128xf32, #tpu.memory_space<vmem>>, vector<128x128xf32>
      %13 = arith.truncf %12 : vector<128x128xf32> to vector<128x128xbf16>
      %c0_11 = arith.constant 0 : index
      %c0_12 = arith.constant 0 : index
      %14 = vector.load %arg4[%c0_11, %c0_12] : memref<128x128xbf16, #tpu.memory_space<vmem>>, vector<128x128xbf16>
      %15 = tpu.concatenate %13, %14 in 1 : vector<128x128xbf16>, vector<128x128xbf16> -> vector<128x256xbf16>
      %c0_13 = arith.constant 0 : index
      %c0_14 = arith.constant 0 : index
      %16 = vector.load %arg5[%c0_13, %c0_14] : memref<256x128xbf16, #tpu.memory_space<vmem>>, vector<256x128xbf16>
      %cst_15 = arith.constant dense<0.000000e+00> : vector<128x128xf32>
      %17 = tpu.matmul %15, %16, %cst_15 {dimension_numbers = #tpu.dot_dimension_numbers<[1], [0], [0], [1], [0, 0, 1, 1], [], []>} : vector<128x256xbf16>, vector<256x128xbf16>, vector<128x128xf32> -> vector<128x128xf32>
      %c0_16 = arith.constant 0 : index
      %c0_17 = arith.constant 0 : index
      %18 = vector.load %arg6[%c0_16, %c0_17] : memref<1x128xf32, #tpu.memory_space<vmem>>, vector<1x128xf32>
      %19 = vector.broadcast %18 : vector<1x128xf32> to vector<128x128xf32>
      %20 = arith.addf %17, %19 : vector<128x128xf32>
      %cst_18 = arith.constant 0.000000e+00 : f32
      %21 = vector.broadcast %cst_18 : f32 to vector<128x128xf32>
      %22 = arith.maximumf %20, %21 : vector<128x128xf32>
      %23 = arith.truncf %22 : vector<128x128xf32> to vector<128x128xbf16>
      %c0_19 = arith.constant 0 : index
      %c0_20 = arith.constant 0 : index
      %24 = vector.load %arg7[%c0_19, %c0_20] : memref<128x128xbf16, #tpu.memory_space<vmem>>, vector<128x128xbf16>
      tpu.vector_store %arg7[%c0_19, %c0_20], %23 {strides = array<i32>} : memref<128x128xbf16, #tpu.memory_space<vmem>>, vector<128x128xbf16>,
    } else {
    }
    return
  }
  func.func @transform_0(%arg0: i32, %arg1: i32) -> (i32, i32) {
    %c0_i32 = arith.constant 0 : i32
    return %arg0, %arg1 : i32, i32
  }
  func.func @transform_1(%arg0: i32, %arg1: i32) -> (i32, i32) {
    %c0_i32 = arith.constant 0 : i32
    %c0_i32_0 = arith.constant 0 : i32
    return %arg1, %c0_i32 : i32, i32
  }
  func.func @transform_2(%arg0: i32, %arg1: i32) -> (i32, i32) {
    %c0_i32 = arith.constant 0 : i32
    %c0_i32_0 = arith.constant 0 : i32
    return %arg0, %c0_i32 : i32, i32
  }
  func.func @transform_3(%arg0: i32, %arg1: i32) -> (i32, i32) {
    %c0_i32 = arith.constant 0 : i32
    %c0_i32_0 = arith.constant 0 : i32
    %c0_i32_1 = arith.constant 0 : i32
    return %c0_i32, %c0_i32_0 : i32, i32
  }
  func.func @transform_4(%arg0: i32, %arg1: i32) -> (i32, i32) {
    %c0_i32 = arith.constant 0 : i32
    %c0_i32_0 = arith.constant 0 : i32
    %c0_i32_1 = arith.constant 0 : i32
    return %c0_i32, %c0_i32_0 : i32, i32
  }
  func.func @transform_5(%arg0: i32, %arg1: i32) -> (i32, i32) {
    %c0_i32 = arith.constant 0 : i32
    %c0_i32_0 = arith.constant 0 : i32
    return %arg0, %c0_i32 : i32, i32
  }
}

module attributes {stable_mosaic.version = 11 : i64} {
  func.func @sage_pool_lin_kernel(%arg0: i32, %arg1: i32, %arg2: memref<128x128xbf16, #tpu.memory_space<vmem>>, %arg3: memref<128x128xbf16, #tpu.memory_space<vmem>>, %arg4: memref<128x128xbf16, #tpu.memory_space<vmem>>, %arg5: memref<8x128xbf16, #tpu.memory_space<vmem>>, %arg6: memref<256x128xbf16, #tpu.memory_space<vmem>>, %arg7: memref<1x128xf32, #tpu.memory_space<vmem>>, %arg8: memref<128x128xf32, #tpu.memory_space<vmem>>, %arg9: memref<1x128xf32, #tpu.memory_space<vmem>>, %arg10: memref<8x128xf32, #tpu.memory_space<vmem>>, %arg11: memref<128x128xf32, #tpu.memory_space<vmem>>, %arg12: memref<8x128xf32, #tpu.memory_space<vmem>>) attributes {dimension_semantics = [#tpu.dimension_semantics<arbitrary>, #tpu.dimension_semantics<arbitrary>], iteration_bounds = array<i64: 2, 2>, scalar_prefetch = 0 : i64, scratch_operands = 2 : i64, tpu.core_type = #tpu.core_type<tc>, window_params = [{transform_indices = @transform_0, window_bounds = array<i64: 128, 128>}, {transform_indices = @transform_1, window_bounds = array<i64: 128, 128>}, {transform_indices = @transform_2, window_bounds = array<i64: 128, 128>}, {transform_indices = @transform_3, window_bounds = array<i64: 8, 128>}, {pipeline_mode = #tpu.pipeline_mode<synchronous>, transform_indices = @transform_4, window_bounds = array<i64: 256, 128>}, {pipeline_mode = #tpu.pipeline_mode<synchronous>, transform_indices = @transform_5, window_bounds = array<i64: 1, 128>}, {pipeline_mode = #tpu.pipeline_mode<synchronous>, transform_indices = @transform_6, window_bounds = array<i64: 128, 128>}, {pipeline_mode = #tpu.pipeline_mode<synchronous>, transform_indices = @transform_7, window_bounds = array<i64: 1, 128>}, {pipeline_mode = #tpu.pipeline_mode<synchronous>, transform_indices = @transform_8, window_bounds = array<i64: 8, 128>}]} {
    %c0_i32 = arith.constant 0 : i32
    %0 = arith.cmpi eq, %arg0, %c0_i32 : i32
    %c0_i32_0 = arith.constant 0 : i32
    %1 = arith.cmpi eq, %arg1, %c0_i32_0 : i32
    %2 = arith.andi %0, %1 : i1
    %3 = arith.extui %2 : i1 to i32
    %c0_i32_1 = arith.constant 0 : i32
    %4 = arith.cmpi ne, %3, %c0_i32_1 : i32
    scf.if %4 {
      %cst_15 = arith.constant 0.000000e+00 : f32
      %22 = vector.broadcast %cst_15 : f32 to vector<8x128xf32>
      %c0_16 = arith.constant 0 : index
      %c0_17 = arith.constant 0 : index
      %23 = vector.load %arg12[%c0_16, %c0_17] : memref<8x128xf32, #tpu.memory_space<vmem>>, vector<8x128xf32>
      tpu.vector_store %arg12[%c0_16, %c0_17], %22 {strides = array<i32>} : memref<8x128xf32, #tpu.memory_space<vmem>>, vector<8x128xf32>,
    } else {
    }
    %c0_i32_2 = arith.constant 0 : i32
    %5 = arith.cmpi eq, %arg1, %c0_i32_2 : i32
    %6 = arith.extui %5 : i1 to i32
    %c0_i32_3 = arith.constant 0 : i32
    %7 = arith.cmpi ne, %6, %c0_i32_3 : i32
    scf.if %7 {
      %cst_15 = arith.constant 0.000000e+00 : f32
      %22 = vector.broadcast %cst_15 : f32 to vector<128x128xf32>
      %c0_16 = arith.constant 0 : index
      %c0_17 = arith.constant 0 : index
      %23 = vector.load %arg11[%c0_16, %c0_17] : memref<128x128xf32, #tpu.memory_space<vmem>>, vector<128x128xf32>
      tpu.vector_store %arg11[%c0_16, %c0_17], %22 {strides = array<i32>} : memref<128x128xf32, #tpu.memory_space<vmem>>, vector<128x128xf32>,
    } else {
    }
    %c0 = arith.constant 0 : index
    %c0_4 = arith.constant 0 : index
    %8 = vector.load %arg11[%c0, %c0_4] : memref<128x128xf32, #tpu.memory_space<vmem>>, vector<128x128xf32>
    %c0_5 = arith.constant 0 : index
    %c0_6 = arith.constant 0 : index
    %9 = vector.load %arg2[%c0_5, %c0_6] : memref<128x128xbf16, #tpu.memory_space<vmem>>, vector<128x128xbf16>
    %c0_7 = arith.constant 0 : index
    %c0_8 = arith.constant 0 : index
    %10 = vector.load %arg3[%c0_7, %c0_8] : memref<128x128xbf16, #tpu.memory_space<vmem>>, vector<128x128xbf16>
    %cst = arith.constant dense<0.000000e+00> : vector<128x128xf32>
    %11 = tpu.matmul %9, %10, %cst {dimension_numbers = #tpu.dot_dimension_numbers<[1], [0], [0], [1], [0, 0, 1, 1], [], []>} : vector<128x128xbf16>, vector<128x128xbf16>, vector<128x128xf32> -> vector<128x128xf32>
    %12 = arith.addf %8, %11 : vector<128x128xf32>
    %c0_9 = arith.constant 0 : index
    %c0_10 = arith.constant 0 : index
    %13 = vector.load %arg11[%c0_9, %c0_10] : memref<128x128xf32, #tpu.memory_space<vmem>>, vector<128x128xf32>
    tpu.vector_store %arg11[%c0_9, %c0_10], %12 {strides = array<i32>} : memref<128x128xf32, #tpu.memory_space<vmem>>, vector<128x128xf32>,
    %c1_i32 = arith.constant 1 : i32
    %14 = arith.cmpi eq, %arg1, %c1_i32 : i32
    %15 = arith.extui %14 : i1 to i32
    %c0_i32_11 = arith.constant 0 : i32
    %16 = arith.cmpi ne, %15, %c0_i32_11 : i32
    scf.if %16 {
      %c0_15 = arith.constant 0 : index
      %c0_16 = arith.constant 0 : index
      %22 = vector.load %arg11[%c0_15, %c0_16] : memref<128x128xf32, #tpu.memory_space<vmem>>, vector<128x128xf32>
      %23 = arith.truncf %22 : vector<128x128xf32> to vector<128x128xbf16>
      %c0_17 = arith.constant 0 : index
      %c0_18 = arith.constant 0 : index
      %24 = vector.load %arg4[%c0_17, %c0_18] : memref<128x128xbf16, #tpu.memory_space<vmem>>, vector<128x128xbf16>
      %25 = tpu.concatenate %23, %24 in 1 : vector<128x128xbf16>, vector<128x128xbf16> -> vector<128x256xbf16>
      %c0_19 = arith.constant 0 : index
      %c0_20 = arith.constant 0 : index
      %26 = vector.load %arg6[%c0_19, %c0_20] : memref<256x128xbf16, #tpu.memory_space<vmem>>, vector<256x128xbf16>
      %cst_21 = arith.constant dense<0.000000e+00> : vector<128x128xf32>
      %27 = tpu.matmul %25, %26, %cst_21 {dimension_numbers = #tpu.dot_dimension_numbers<[1], [0], [0], [1], [0, 0, 1, 1], [], []>} : vector<128x256xbf16>, vector<256x128xbf16>, vector<128x128xf32> -> vector<128x128xf32>
      %c0_22 = arith.constant 0 : index
      %c0_23 = arith.constant 0 : index
      %28 = vector.load %arg7[%c0_22, %c0_23] : memref<1x128xf32, #tpu.memory_space<vmem>>, vector<1x128xf32>
      %29 = vector.broadcast %28 : vector<1x128xf32> to vector<128x128xf32>
      %30 = arith.addf %27, %29 : vector<128x128xf32>
      %c0_24 = arith.constant 0 : index
      %c0_25 = arith.constant 0 : index
      %31 = vector.load %arg12[%c0_24, %c0_25] : memref<8x128xf32, #tpu.memory_space<vmem>>, vector<8x128xf32>
      %c0_26 = arith.constant 0 : index
      %c0_27 = arith.constant 0 : index
      %32 = vector.load %arg5[%c0_26, %c0_27] : memref<8x128xbf16, #tpu.memory_space<vmem>>, vector<8x128xbf16>
      %33 = arith.truncf %30 : vector<128x128xf32> to vector<128x128xbf16>
      %cst_28 = arith.constant dense<0.000000e+00> : vector<8x128xf32>
      %34 = tpu.matmul %32, %33, %cst_28 {dimension_numbers = #tpu.dot_dimension_numbers<[1], [0], [0], [1], [0, 0, 1, 1], [], []>} : vector<8x128xbf16>, vector<128x128xbf16>, vector<8x128xf32> -> vector<8x128xf32>
      %35 = arith.addf %31, %34 : vector<8x128xf32>
      %c0_29 = arith.constant 0 : index
      %c0_30 = arith.constant 0 : index
      %36 = vector.load %arg12[%c0_29, %c0_30] : memref<8x128xf32, #tpu.memory_space<vmem>>, vector<8x128xf32>
      tpu.vector_store %arg12[%c0_29, %c0_30], %35 {strides = array<i32>} : memref<8x128xf32, #tpu.memory_space<vmem>>, vector<8x128xf32>,
    } else {
    }
    %c1_i32_12 = arith.constant 1 : i32
    %17 = arith.cmpi eq, %arg0, %c1_i32_12 : i32
    %c1_i32_13 = arith.constant 1 : i32
    %18 = arith.cmpi eq, %arg1, %c1_i32_13 : i32
    %19 = arith.andi %17, %18 : i1
    %20 = arith.extui %19 : i1 to i32
    %c0_i32_14 = arith.constant 0 : i32
    %21 = arith.cmpi ne, %20, %c0_i32_14 : i32
    scf.if %21 {
      %c0_15 = arith.constant 0 : index
      %c0_16 = arith.constant 0 : index
      %22 = vector.load %arg12[%c0_15, %c0_16] : memref<8x128xf32, #tpu.memory_space<vmem>>, vector<8x128xf32>
      %c0_17 = arith.constant 0 : index
      %c0_18 = arith.constant 0 : index
      %23 = vector.load %arg8[%c0_17, %c0_18] : memref<128x128xf32, #tpu.memory_space<vmem>>, vector<128x128xf32>
      %cst_19 = arith.constant dense<0.000000e+00> : vector<8x128xf32>
      %24 = tpu.matmul %22, %23, %cst_19 {dimension_numbers = #tpu.dot_dimension_numbers<[1], [0], [0], [1], [0, 0, 1, 1], [], []>} : vector<8x128xf32>, vector<128x128xf32>, vector<8x128xf32> -> vector<8x128xf32>
      %c0_20 = arith.constant 0 : index
      %c0_21 = arith.constant 0 : index
      %25 = vector.load %arg9[%c0_20, %c0_21] : memref<1x128xf32, #tpu.memory_space<vmem>>, vector<1x128xf32>
      %26 = vector.broadcast %25 : vector<1x128xf32> to vector<8x128xf32>
      %27 = arith.addf %24, %26 : vector<8x128xf32>
      %c0_22 = arith.constant 0 : index
      %c0_23 = arith.constant 0 : index
      %28 = vector.load %arg10[%c0_22, %c0_23] : memref<8x128xf32, #tpu.memory_space<vmem>>, vector<8x128xf32>
      tpu.vector_store %arg10[%c0_22, %c0_23], %27 {strides = array<i32>} : memref<8x128xf32, #tpu.memory_space<vmem>>, vector<8x128xf32>,
    } else {
    }
    return
  }
  func.func @transform_0(%arg0: i32, %arg1: i32) -> (i32, i32) {
    %c0_i32 = arith.constant 0 : i32
    return %arg0, %arg1 : i32, i32
  }
  func.func @transform_1(%arg0: i32, %arg1: i32) -> (i32, i32) {
    %c0_i32 = arith.constant 0 : i32
    %c0_i32_0 = arith.constant 0 : i32
    return %arg1, %c0_i32 : i32, i32
  }
  func.func @transform_2(%arg0: i32, %arg1: i32) -> (i32, i32) {
    %c0_i32 = arith.constant 0 : i32
    %c0_i32_0 = arith.constant 0 : i32
    return %arg0, %c0_i32 : i32, i32
  }
  func.func @transform_3(%arg0: i32, %arg1: i32) -> (i32, i32) {
    %c0_i32 = arith.constant 0 : i32
    %c0_i32_0 = arith.constant 0 : i32
    return %c0_i32, %arg0 : i32, i32
  }
  func.func @transform_4(%arg0: i32, %arg1: i32) -> (i32, i32) {
    %c0_i32 = arith.constant 0 : i32
    %c0_i32_0 = arith.constant 0 : i32
    %c0_i32_1 = arith.constant 0 : i32
    return %c0_i32, %c0_i32_0 : i32, i32
  }
  func.func @transform_5(%arg0: i32, %arg1: i32) -> (i32, i32) {
    %c0_i32 = arith.constant 0 : i32
    %c0_i32_0 = arith.constant 0 : i32
    %c0_i32_1 = arith.constant 0 : i32
    return %c0_i32, %c0_i32_0 : i32, i32
  }
  func.func @transform_6(%arg0: i32, %arg1: i32) -> (i32, i32) {
    %c0_i32 = arith.constant 0 : i32
    %c0_i32_0 = arith.constant 0 : i32
    %c0_i32_1 = arith.constant 0 : i32
    return %c0_i32, %c0_i32_0 : i32, i32
  }
  func.func @transform_7(%arg0: i32, %arg1: i32) -> (i32, i32) {
    %c0_i32 = arith.constant 0 : i32
    %c0_i32_0 = arith.constant 0 : i32
    %c0_i32_1 = arith.constant 0 : i32
    return %c0_i32, %c0_i32_0 : i32, i32
  }
  func.func @transform_8(%arg0: i32, %arg1: i32) -> (i32, i32) {
    %c0_i32 = arith.constant 0 : i32
    %c0_i32_0 = arith.constant 0 : i32
    %c0_i32_1 = arith.constant 0 : i32
    return %c0_i32, %c0_i32_0 : i32, i32
  }
}

module attributes {stable_mosaic.version = 11 : i64} {
  func.func @sage_layer_kernel(%arg0: i32, %arg1: i32, %arg2: memref<128x128xbf16, #tpu.memory_space<vmem>>, %arg3: memref<128x128xbf16, #tpu.memory_space<vmem>>, %arg4: memref<128x128xbf16, #tpu.memory_space<vmem>>, %arg5: memref<256x128xbf16, #tpu.memory_space<vmem>>, %arg6: memref<1x128xf32, #tpu.memory_space<vmem>>, %arg7: memref<128x128xbf16, #tpu.memory_space<vmem>>, %arg8: memref<128x128xf32, #tpu.memory_space<vmem>>) attributes {dimension_semantics = [#tpu.dimension_semantics<parallel>, #tpu.dimension_semantics<arbitrary>], iteration_bounds = array<i64: 2, 2>, scalar_prefetch = 0 : i64, scratch_operands = 1 : i64, tpu.core_type = #tpu.core_type<tc>, window_params = [{transform_indices = @transform_0, window_bounds = array<i64: 128, 128>}, {transform_indices = @transform_1, window_bounds = array<i64: 128, 128>}, {transform_indices = @transform_2, window_bounds = array<i64: 128, 128>}, {pipeline_mode = #tpu.pipeline_mode<synchronous>, transform_indices = @transform_3, window_bounds = array<i64: 256, 128>}, {pipeline_mode = #tpu.pipeline_mode<synchronous>, transform_indices = @transform_4, window_bounds = array<i64: 1, 128>}, {transform_indices = @transform_5, window_bounds = array<i64: 128, 128>}]} {
    %c0_i32 = arith.constant 0 : i32
    %0 = arith.cmpi eq, %arg1, %c0_i32 : i32
    %1 = arith.extui %0 : i1 to i32
    %c0_i32_0 = arith.constant 0 : i32
    %2 = arith.cmpi ne, %1, %c0_i32_0 : i32
    scf.if %2 {
      %cst_9 = arith.constant 0.000000e+00 : f32
      %12 = vector.broadcast %cst_9 : f32 to vector<128x128xf32>
      %c0_10 = arith.constant 0 : index
      %c0_11 = arith.constant 0 : index
      %13 = vector.load %arg8[%c0_10, %c0_11] : memref<128x128xf32, #tpu.memory_space<vmem>>, vector<128x128xf32>
      tpu.vector_store %arg8[%c0_10, %c0_11], %12 {strides = array<i32>} : memref<128x128xf32, #tpu.memory_space<vmem>>, vector<128x128xf32>,
    } else {
    }
    %c0 = arith.constant 0 : index
    %c0_1 = arith.constant 0 : index
    %3 = vector.load %arg8[%c0, %c0_1] : memref<128x128xf32, #tpu.memory_space<vmem>>, vector<128x128xf32>
    %c0_2 = arith.constant 0 : index
    %c0_3 = arith.constant 0 : index
    %4 = vector.load %arg2[%c0_2, %c0_3] : memref<128x128xbf16, #tpu.memory_space<vmem>>, vector<128x128xbf16>
    %c0_4 = arith.constant 0 : index
    %c0_5 = arith.constant 0 : index
    %5 = vector.load %arg3[%c0_4, %c0_5] : memref<128x128xbf16, #tpu.memory_space<vmem>>, vector<128x128xbf16>
    %cst = arith.constant dense<0.000000e+00> : vector<128x128xf32>
    %6 = tpu.matmul %4, %5, %cst {dimension_numbers = #tpu.dot_dimension_numbers<[1], [0], [0], [1], [0, 0, 1, 1], [], []>} : vector<128x128xbf16>, vector<128x128xbf16>, vector<128x128xf32> -> vector<128x128xf32>
    %7 = arith.addf %3, %6 : vector<128x128xf32>
    %c0_6 = arith.constant 0 : index
    %c0_7 = arith.constant 0 : index
    %8 = vector.load %arg8[%c0_6, %c0_7] : memref<128x128xf32, #tpu.memory_space<vmem>>, vector<128x128xf32>
    tpu.vector_store %arg8[%c0_6, %c0_7], %7 {strides = array<i32>} : memref<128x128xf32, #tpu.memory_space<vmem>>, vector<128x128xf32>,
    %c1_i32 = arith.constant 1 : i32
    %9 = arith.cmpi eq, %arg1, %c1_i32 : i32
    %10 = arith.extui %9 : i1 to i32
    %c0_i32_8 = arith.constant 0 : i32
    %11 = arith.cmpi ne, %10, %c0_i32_8 : i32
    scf.if %11 {
      %c0_9 = arith.constant 0 : index
      %c0_10 = arith.constant 0 : index
      %12 = vector.load %arg8[%c0_9, %c0_10] : memref<128x128xf32, #tpu.memory_space<vmem>>, vector<128x128xf32>
      %13 = arith.truncf %12 : vector<128x128xf32> to vector<128x128xbf16>
      %c0_11 = arith.constant 0 : index
      %c0_12 = arith.constant 0 : index
      %14 = vector.load %arg4[%c0_11, %c0_12] : memref<128x128xbf16, #tpu.memory_space<vmem>>, vector<128x128xbf16>
      %15 = tpu.concatenate %13, %14 in 1 : vector<128x128xbf16>, vector<128x128xbf16> -> vector<128x256xbf16>
      %c0_13 = arith.constant 0 : index
      %c0_14 = arith.constant 0 : index
      %16 = vector.load %arg5[%c0_13, %c0_14] : memref<256x128xbf16, #tpu.memory_space<vmem>>, vector<256x128xbf16>
      %cst_15 = arith.constant dense<0.000000e+00> : vector<128x128xf32>
      %17 = tpu.matmul %15, %16, %cst_15 {dimension_numbers = #tpu.dot_dimension_numbers<[1], [0], [0], [1], [0, 0, 1, 1], [], []>} : vector<128x256xbf16>, vector<256x128xbf16>, vector<128x128xf32> -> vector<128x128xf32>
      %c0_16 = arith.constant 0 : index
      %c0_17 = arith.constant 0 : index
      %18 = vector.load %arg6[%c0_16, %c0_17] : memref<1x128xf32, #tpu.memory_space<vmem>>, vector<1x128xf32>
      %19 = vector.broadcast %18 : vector<1x128xf32> to vector<128x128xf32>
      %20 = arith.addf %17, %19 : vector<128x128xf32>
      %cst_18 = arith.constant 0.000000e+00 : f32
      %21 = vector.broadcast %cst_18 : f32 to vector<128x128xf32>
      %22 = arith.maximumf %20, %21 : vector<128x128xf32>
      %23 = arith.truncf %22 : vector<128x128xf32> to vector<128x128xbf16>
      %c0_19 = arith.constant 0 : index
      %c0_20 = arith.constant 0 : index
      %24 = vector.load %arg7[%c0_19, %c0_20] : memref<128x128xbf16, #tpu.memory_space<vmem>>, vector<128x128xbf16>
      tpu.vector_store %arg7[%c0_19, %c0_20], %23 {strides = array<i32>} : memref<128x128xbf16, #tpu.memory_space<vmem>>, vector<128x128xbf16>,
    } else {
    }
    return
  }
  func.func @transform_0(%arg0: i32, %arg1: i32) -> (i32, i32) {
    %c0_i32 = arith.constant 0 : i32
    return %arg0, %arg1 : i32, i32
  }
  func.func @transform_1(%arg0: i32, %arg1: i32) -> (i32, i32) {
    %c0_i32 = arith.constant 0 : i32
    %c0_i32_0 = arith.constant 0 : i32
    return %arg1, %c0_i32 : i32, i32
  }
  func.func @transform_2(%arg0: i32, %arg1: i32) -> (i32, i32) {
    %c0_i32 = arith.constant 0 : i32
    %c0_i32_0 = arith.constant 0 : i32
    return %arg0, %c0_i32 : i32, i32
  }
  func.func @transform_3(%arg0: i32, %arg1: i32) -> (i32, i32) {
    %c0_i32 = arith.constant 0 : i32
    %c0_i32_0 = arith.constant 0 : i32
    %c0_i32_1 = arith.constant 0 : i32
    return %c0_i32, %c0_i32_0 : i32, i32
  }
  func.func @transform_4(%arg0: i32, %arg1: i32) -> (i32, i32) {
    %c0_i32 = arith.constant 0 : i32
    %c0_i32_0 = arith.constant 0 : i32
    %c0_i32_1 = arith.constant 0 : i32
    return %c0_i32, %c0_i32_0 : i32, i32
  }
  func.func @transform_5(%arg0: i32, %arg1: i32) -> (i32, i32) {
    %c0_i32 = arith.constant 0 : i32
    %c0_i32_0 = arith.constant 0 : i32
    return %arg0, %c0_i32 : i32, i32
  }
}

</mosaic_0001>

<bundles_post_ra>
// kernel: sagenet_forward.3
= control target key start
LH: loop header
LB: loop body
LE: loop exit
PB: predicated region body
PF: predicated region fallthrough
CT: control target
= control target key end

     0   :  { %s2330_s0 = inlined_call_operand.hbm [shape: bf16[256,256], index: 0, kind: input, shape index: {}]   ;;  %s2331_s1 = inlined_call_operand.hbm [shape: bf16[256,128], index: 1, kind: input, shape index: {}, may-alias: {1,2}]   ;;  %s2332_s2 = inlined_call_operand.hbm [shape: bf16[256,128], index: 2, kind: input, shape index: {}, may-alias: {1,2}]   ;;  %s2333_s3 = inlined_call_operand.hbm [shape: bf16[256,128], index: 3, kind: input, shape index: {}]   ;;  %s2334_s4 = inlined_call_operand.vmem [shape: f32[1,128], index: 4, kind: input, shape index: {}]   ;;  %s2335_s5 = inlined_call_operand.vmem [shape: bf16[256,128], index: 5, kind: output, shape index: {}]  }
   0x1   :  { %2349 = sst [smem:[#allocation21_spill]] %s2330_s0 }
   0x2   :  { %2350 = sst [smem:[#allocation22_spill]] %s2331_s1 }
   0x3   :  { %2351 = sst [smem:[#allocation23_spill]] %s2334_s4 }
   0x4   :  { %2352 = sst [smem:[#allocation24_spill]] %s2335_s5 }
   0x5   :  { %10 = vsyncpa [#allocation4], 0 }
   0x6   :  { %12 = vsyncpa [#allocation4 + $0x1], 0 }
   0x7   :  { %13 = vsyncpa [#allocation6], 0 }
   0x8   :  { %15 = vsyncpa [#allocation6 + $0x1], 0 }
   0x9   :  { %16 = vsyncpa [#allocation9], 0  ;;  %s1958_s18 = smov 0   ;;  %s1960_s19 = smov 0  }
   0xa   :  { %s1962_s20 = smov 0   ;;  %s1964_s21 = smov 0  }
   0xb   :  { %s1966_s22 = smov 0   ;;  %s1968_s23 = smov 0  }
   0xc   :  { %s1970_s24 = smov 0   ;;  %s1972_s25 = smov 0  }
   0xd   :  { %s1974_s26 = smov 0   ;;  %s1976_s27 = smov 0  }
   0xe   :  { %s1978_s28 = smov 0   ;;  %s1980_s29 = smov 0  }
   0xf   :  { %s1982_s30 = smov 0   ;;  %s1984_s6 = smov 0  }
  0x10 LB: > { %2353 = sst [smem:[#allocation14_spill]] %s1886_s23  ;;  %s31_s7 = sadd.s32 1, %s1910_s29  ;;  %s1918_s6 = sphi %s1984_s6, %s22_s6   ;;  %s1914_s30 = sphi %s1982_s30, %s2404_s30   ;;  %s1910_s29 = sphi %s1980_s29, %s2403_s29   ;;  %s1906_s28 = sphi %s1978_s28, %s2402_s28   ;;  %s1902_s27 = sphi %s1976_s27, %s2401_s27   ;;  %s1898_s26 = sphi %s1974_s26, %s2400_s26   ;;  %s1894_s25 = sphi %s1972_s25, %s2399_s25   ;;  %s1890_s24 = sphi %s1970_s24, %s2398_s24   ;;  %s1886_s23 = sphi %s1968_s23, %s2389_s23   ;;  %s1882_s22 = sphi %s1966_s22, %s2397_s22   ;;  %s1878_s21 = sphi %s1964_s21, %s2396_s21   ;;  %s1874_s20 = sphi %s1962_s20, %s2395_s20   ;;  %s1870_s19 = sphi %s1960_s19, %s2394_s19   ;;  %s1866_s18 = sphi %s1958_s18, %s2393_s18  }
  0x11   : > { %2354 = sst [smem:[#allocation15_spill]] %s1902_s27  ;;  %s34_s8 = sadd.s32 1, %s1914_s30 }
  0x12   : > { %2355 = sst [smem:[#allocation16_spill]] %s1906_s28  ;;  %p32_p0 = scmp.ge.s32.totalorder %s31_s7, 2 }
  0x13   : > { %p2339_p1 = scmp.eq.s32.totalorder %s1918_s6, 0  ;;  %s69_s9 = sadd.s32 1, %s1886_s23 }
  0x14   : > { %p76_p2 = scmp.ne.s32.totalorder %s1886_s23, %s1882_s22  ;;  %s2406_s7 = smov (%p32_p0, %s31_s7), 0 }
  0x15   : > { %2356 = sst [smem:[#allocation17_spill]] %s2406_s7  ;;  %s2408_s8 = smov (!%p32_p0, %s34_s8), %s1914_s30 }
  0x16   : > { %s39_s10 = ssub.s32 %s1910_s29, %s2406_s7  ;;  %p2041_p3 = por %p76_p2, %p2339_p1 }
  0x17   : > { %p36_p4 = scmp.ge.s32.totalorder %s2408_s8, 2  ;;  %p67_p5 = scmp.eq.s32.totalorder %s39_s10, 0 }
  0x18   : > { %p82_p6 = scmp.ne.s32.totalorder %s1882_s22, %s1878_s21  ;;  %p2338_p9 = scmp.lt.s32.totalorder %s1918_s6, 4 }
  0x19   : > { %s2410_s8 = smov (%p36_p4, %s2408_s8), 0  ;;  %s239_s16 = sand.u32 1, %s1918_s6  }
  0x1a   : > { %2358 = sst [smem:[#allocation18_spill]] %s2410_s8  ;;  %s2054_s13 = ssub.s32 %s1914_s30, %s2410_s8 }
  0x1b   : > { %s2050_s12 = scalar_select %p67_p5, %s1886_s23, %s69_s9  }
  0x1c   : > { %s40_s14 = sor.u32 %s39_s10, %s2054_s13  ;;  %s241_s17 = sand.u32 1, %s1886_s23  }
  0x1d   : > { %2359 = sst [smem:[#allocation19_spill]] %s2050_s12  ;;  %p2058_p8 = scmp.eq.s32.totalorder %s40_s14, 0 }
  0x1e   : > { %s1214_s7 = sshll.u32 %s241_s17, 6  ;;  %s1289_s4 = sshll.u32 %s1910_s29, 10 }
  0x1f   : > { %s2361_s1 = sld [smem:[#allocation22_spill]]  ;;  %s243_s12 = scalar_lea.vmem [#allocation5], %s1214_s7 }
  0x20   : > { %s250_s8 = sshll.u32 %s243_s12, 4  ;;  %p2073_p10 = pnand %p2338_p9, %p2041_p3  ;;  %s251_s8 = int_to_ptr.vmem [resolvable:$true] %s250_s8 }
  0x21   : > { %s2077_s14 = scalar_lea.sflag [#allocation6], %s239_s16  ;;  %s1695_s17 = scalar_lea.vmem %s251_s8, 1024 }
  0x22   : > { %p1684_p11 = pneg %p2073_p10  ;;  %p1696_p12 = scmp.ne.s32.totalorder %s251_s8, %s1695_s17 }
  0x23   : > { %s1920_s5 = smov [#allocation5]  }
  0x24   : > { %p1698_p13 = pnand %p1696_p12, %p1684_p11 }
  0x25   : > { %s249_s9 = scalar_lea.hbm %s2361_s1, %s1289_s4  ;;  %s1700_s4 = sshll.u32 %s1920_s5, 4  ;;  %s1701_s4 = int_to_ptr.vmem [resolvable:$false] %s1700_s4 }
  0x26   : > { %p1699_p0 = pneg %p1698_p13  ;;  %s1702_s27 = scalar_lea.vmem %s1701_s4, 2048 }
  0x27   : > { %p1703_p2 = scmp.lt.s32.totalorder %s251_s8, %s1701_s4  ;;  %p1704_p4 = scmp.lt.s32.totalorder %s1702_s27, %s1695_s17 }
  0x29   : > { %p1705_p3 = por %p1704_p4, %p1703_p2 }
  0x2b   : > { %p1706_p5 = pnand %p1705_p3, %p1699_p0 }
  0x2d   : > { %1709 = shalt.err (!%p1706_p5)
}
  0x2e   : > { %s2344_s7 = smov 64   ;;  %s2346_s11 = smov 4  }
  0x2f   : > { %1518 = dma.hbm_to_vmem [thread:$0]  (!%p2073_p10), %s249_s9, 1024, %s251_s8, %s2077_s14, %s2344_s7, %s2344_s7, %s2346_s11  }
  0x30   : > { %s2340_s12 = sadd.s32 4294967295, %s1918_s6   ;;  %p1207_p11 = scmp.ge.s32.totalorder %s1918_s6, 1 }
  0x31   : > { %p2091_p12 = scmp.eq.s32.totalorder %s2340_s12, 0  ;;  %p187_p13 = scmp.lt.s32.totalorder %s1918_s6, 5 }
  0x32   : > { %s1923_s8 = smov [#allocation8]   ;;  %s43_s5 = sadd.s32 1, %s1898_s26 }
  0x33   : > { %p2101_p0 = por %p82_p6, %p2091_p12  ;;  %p2105_p2 = pnand %p1207_p11, %p187_p13 }
  0x34   : > { %s199_s9 = sshll.u32 %s1923_s8, 4  ;;  %s200_s9 = int_to_ptr.vmem [resolvable:$true] %s199_s9 }
  0x35   : > { %s2364_s17 = scalar_select %p2101_p0, 1, 0 }
  0x36   : > { %p1508_p10 = pneg %p2105_p2  ;;  %s1721_s4 = scalar_lea.vmem %s200_s9, 2048 }
  0x37   : > { %2365 = sst [smem:[#allocation20_spill]] %s2364_s17  ;;  %p1722_p5 = scmp.ne.s32.totalorder %s200_s9, %s1721_s4 }
  0x38   : > { %p1509_p4 = pnand %p1508_p10, %p2091_p12  ;;  %p1729_p9 = scmp.lt.s32.totalorder %s200_s9, %s200_s9 }
  0x39   : > { %p1730_p1 = scmp.lt.s32.totalorder %s1721_s4, %s1721_s4 }
  0x3a   : > { %p1712_p3 = pneg %p1509_p4 }
  0x3b   : > { %p1731_p11 = por %p1730_p1, %p1729_p9 }
  0x3c   : > { %p1724_p6 = pnand %p1722_p5, %p1712_p3 }
  0x3e   : > { %p1725_p7 = pneg %p1724_p6 }
  0x40   : > { %p1732_p13 = pnand %p1731_p11, %p1725_p7 }
  0x42   : > { %1735 = shalt.err (!%p1732_p13)
}
  0x43   : > { %1511 = dma.hbm_to_vmem [thread:$0]  (!%p1509_p4), %s2333_s3, 2048, %s200_s9, [#allocation9], %s2344_s7, %s2344_s7, %s2346_s11  }
  0x44   : > { %s2123_s8 = scalar_select %p2058_p8, %s1898_s26, %s43_s5  }
  0x45   : > { %p50_p1 = scmp.ne.s32.totalorder %s1898_s26, %s1894_s25  ;;  %p56_p7 = scmp.ne.s32.totalorder %s1894_s25, %s1890_s24 }
  0x46   : > { %s216_s4 = sand.u32 1, %s1898_s26   ;;  %s1288_s21 = sshll.u32 %s1914_s30, 5 }
  0x47   : > { %p2367_p9 = scmp.eq.s32.totalorder %s1918_s6, 0  ;;  %p2135_p3 = por %p2091_p12, %p56_p7 }
  0x48   : > { %s1210_s12 = sshll.u32 %s216_s4, 6  ;;  %s226_s1 = sadd.s32 %s1910_s29, %s1288_s21 }
  0x49   : > { %p52_p10 = por %p2367_p9, %p50_p1  ;;  %s1213_s23 = sshll.u32 %s226_s1, 6 }
  0x4a   : > { %s220_s28 = scalar_lea.vmem [#allocation3], %s1210_s12  ;;  %s2369_s0 = sld [smem:[#allocation21_spill]] }
  0x4b   : > { %s229_s17 = sshll.u32 %s220_s28, 4  ;;  %p2370_p8 = scmp.lt.s32.totalorder %s1918_s6, 4  ;;  %s230_s17 = int_to_ptr.vmem [resolvable:$true] %s229_s17 }
  0x4c   : > { %s217_s7 = scalar_lea.sflag [#allocation4], %s216_s4  ;;  %s1749_s11 = scalar_lea.vmem %s230_s17, 1024 }
  0x4d   : > { %p2145_p4 = pnand %p2370_p8, %p52_p10  ;;  %p1750_p6 = scmp.ne.s32.totalorder %s230_s17, %s1749_s11 }
  0x4e   : > { %s1924_s1 = smov [#allocation3]  }
  0x4f   : > { %p1738_p5 = pneg %p2145_p4  ;;  %s1754_s28 = sshll.u32 %s1924_s1, 4  ;;  %s1755_s28 = int_to_ptr.vmem [resolvable:$false] %s1754_s28 }
  0x50   : > { %s228_s5 = scalar_lea.hbm %s2369_s0, %s1213_s23  ;;  %s1756_s12 = scalar_lea.vmem %s1755_s28, 2048 }
  0x51   : > { %p1752_p11 = pnand %p1750_p6, %p1738_p5  ;;  %p1757_p1 = scmp.lt.s32.totalorder %s230_s17, %s1755_s28 }
  0x52   : > { %p1758_p7 = scmp.lt.s32.totalorder %s1756_s12, %s1749_s11 }
  0x53   : > { %p1753_p13 = pneg %p1752_p11 }
  0x54   : > { %p1759_p9 = por %p1758_p7, %p1757_p1 }
  0x56   : > { %p1760_p0 = pnand %p1759_p9, %p1753_p13 }
  0x58   : > { %1763 = shalt.err (!%p1760_p0)
}
  0x59   : > { %s1925_s23 = smov 128   ;;  %s2372_s21 = smov 4  }
  0x5a   : > { %s2373_s4 = smov 64   ;;  %s95_s11 = sadd.s32 1, %s1874_s20 }
  0x5b   : > { %1515 = dma.hbm_to_vmem [thread:$0]  (!%p2145_p4), %s228_s5, 1024, %s230_s17, %s217_s7, %s1925_s23, %s2373_s4, %s2372_s21  }
  0x5c   : > { %p2374_p0 = scmp.eq.s32.totalorder %s2054_s13, 0  ;;  %p102_p10 = scmp.ne.s32.totalorder %s1874_s20, %s1870_s19 }
  0x5d   : > { %p108_p8 = scmp.ne.s32.totalorder %s1870_s19, %s1866_s18  ;;  %s262_s15 = sand.u32 1, %s1874_s20  }
  0x5e   : > { %s2159_s9 = scalar_select %p2374_p0, %s1874_s20, %s95_s11  }
  0x5f   : > { %s1290_s24 = sshll.u32 %s1914_s30, 10  ;;  %p2375_p5 = scmp.eq.s32.totalorder %s1918_s6, 0 }
  0x60   : > { %p2171_p11 = por %p108_p8, %p2091_p12  ;;  %s1217_s28 = sshll.u32 %s262_s15, 6 }
  0x61   : > { %p104_p6 = por %p102_p10, %p2375_p5  ;;  %s270_s7 = scalar_lea.hbm %s2332_s2, %s1290_s24 }
  0x62   : > { %p2377_p4 = scmp.lt.s32.totalorder %s1918_s6, 4  ;;  %s264_s18 = scalar_lea.vmem [#allocation7], %s1217_s28 }
  0x63   : > { %s271_s17 = sshll.u32 %s264_s18, 4  ;;  %s1926_s23 = smov [#allocation7]   ;;  %s272_s17 = int_to_ptr.vmem [resolvable:$true] %s271_s17 }
  0x64   : > { %p2180_p13 = pnand %p2377_p4, %p104_p6  ;;  %s1777_s5 = scalar_lea.vmem %s272_s17, 1024 }
  0x65   : > { %p1778_p7 = scmp.ne.s32.totalorder %s272_s17, %s1777_s5  ;;  %s1782_s11 = sshll.u32 %s1926_s23, 4  ;;  %s1783_s11 = int_to_ptr.vmem [resolvable:$false] %s1782_s11 }
  0x66   : > { %p1766_p1 = pneg %p2180_p13  ;;  %s1784_s0 = scalar_lea.vmem %s1783_s11, 2048 }
  0x67   : > { %p1785_p10 = scmp.lt.s32.totalorder %s272_s17, %s1783_s11  ;;  %p1786_p8 = scmp.lt.s32.totalorder %s1784_s0, %s1777_s5 }
  0x68   : > { %p1780_p9 = pnand %p1778_p7, %p1766_p1 }
  0x69   : > { %p1787_p5 = por %p1786_p8, %p1785_p10 }
  0x6a   : > { %p1781_p0 = pneg %p1780_p9 }
  0x6c   : > { %p1788_p6 = pnand %p1787_p5, %p1781_p0 }
  0x6e   : > { %1791 = shalt.err (!%p1788_p6)
}
  0x6f   : > { %1521 = dma.hbm_to_vmem [thread:$0]  (!%p2180_p13), %s270_s7, 1024, %s272_s17, %s2077_s14, %s2373_s4, %s2373_s4, %s2372_s21  }
  0x70   : > { %283 = sbr.rel (%p2105_p2) target bundleno = 665 (0x299), region = 40  ;;  %s285_s15 = sand.u32 (!%p2105_p2), 1, %s1894_s25  }
  0x71   : > { %s1221_s24 = sshll.u32 (!%p2105_p2), %s285_s15, 6  ;;  %s286_s28 = scalar_lea.sflag (!%p2105_p2), [#allocation4], %s285_s15 }
  0x72   : > { %s2195_s12 = scalar_lea.vmem (!%p2105_p2), [#allocation3], %s1221_s24 }
  0x75   : > { %1849 = dma.done.wait (%p2135_p3), %s286_s28, 1024  }
  0x76   : > { %1851 = vsyncadd (%p2135_p3), %s286_s28, 4294966272  ;;  %s2379_s13 = sadd.s32 4294967295, %s1918_s6   ;;  %s2380_s18 = sld [smem:[#allocation20_spill]] }
  0x77   : > { %s294_s14 = sand.u32 1, %s2379_s13   ;;  %s296_s21 = sand.u32 1, %s1882_s22  }
  0x78   : > { %s1222_s10 = sshll.u32 %s296_s21, 6  ;;  %s295_s4 = scalar_lea.sflag [#allocation6], %s294_s14 }
  0x79   : > { %s2204_s7 = scalar_lea.vmem [#allocation5], %s1222_s10 }
  0x7c   : > { %p2381_p2 = scmp.ne.s32.totalorder %s2380_s18, 0 }
  0x7e   : > { %1853 = dma.done.wait (%p2381_p2), %s295_s4, 1024  }
  0x7f   : > { %1855 = vsyncadd (%p2381_p2), %s295_s4, 4294966272  ;;  %s305_s17 = sand.u32 1, %s1870_s19  }
  0x80   : > { %s1223_s27 = sshll.u32 %s305_s17, 6 }
  0x81   : > { %s2211_s5 = scalar_lea.vmem [#allocation7], %s1223_s27 }
  0x82   : > { %1857 = dma.done.wait (%p2171_p11), %s295_s4, 1024  }
  0x83   : > { %1859 = vsyncadd (%p2171_p11), %s295_s4, 4294966272 }
  0x84   : > { %1861 = dma.done.wait (%p2091_p12), [#allocation9], 2048  }
  0x85   : > { %1863 = vsyncadd (%p2091_p12), [#allocation9], 4294965248  ;;  %s2382_s23 = sld [smem:[#allocation16_spill]] }
  0x86   : > { %s2383_s28 = sld [smem:[#allocation24_spill]] }
  0x87   : > { %s2384_s18 = sld [smem:[#allocation15_spill]] }
  0x8b   : > { %s1225_s11 = sshll.u32 %s2382_s23, 4 }
  0x8c   : > { %p352_p3 = scmp.lt.s32.totalorder %s1225_s11, 31 }
  0x8d   : > { %p1227_p4 = scmp.ne.s32.totalorder %s2384_s18, 0 }
  0x8e   : > { %s2412_s11 = smov (!%p352_p3, %s1225_s11), 31 }
  0x8f   : > { %s1226_s0 = sshll.u32 %s2412_s11, 2  ;;  %361 = sbr.rel (%p1227_p4) target bundleno = 157 (0x9d), region = 60 }
  0x90   : > { %s2225_s13 = scalar_lea.vmem %s2383_s28, %s1226_s0 }
  0x94   : > { %v1927_v0 = vmov 0.0  }
  0x95   : > { %362 = vst [vmem:[#allocation2 + $0x30] sm:$0xff] %v1927_v0  ;;  %363 = vst [vmem:[#allocation2] sm:$0xff] %v1927_v0 }
  0x96   : > { %364 = vst [vmem:[#allocation2 + $0x58] sm:$0xff] %v1927_v0  ;;  %365 = vst [vmem:[#allocation2 + $0x18] sm:$0xff] %v1927_v0 }
  0x97   : > { %366 = vst [vmem:[#allocation2 + $0x50] sm:$0xff] %v1927_v0  ;;  %367 = vst [vmem:[#allocation2 + $0x68] sm:$0xff] %v1927_v0 }
  0x98   : > { %368 = vst [vmem:[#allocation2 + $0x8] sm:$0xff] %v1927_v0  ;;  %369 = vst [vmem:[#allocation2 + $0x48] sm:$0xff] %v1927_v0 }
  0x99   : > { %370 = vst [vmem:[#allocation2 + $0x40] sm:$0xff] %v1927_v0  ;;  %371 = vst [vmem:[#allocation2 + $0x20] sm:$0xff] %v1927_v0 }
  0x9a   : > { %372 = vst [vmem:[#allocation2 + $0x10] sm:$0xff] %v1927_v0  ;;  %373 = vst [vmem:[#allocation2 + $0x38] sm:$0xff] %v1927_v0 }
  0x9b   : > { %374 = vst [vmem:[#allocation2 + $0x60] sm:$0xff] %v1927_v0  ;;  %375 = vst [vmem:[#allocation2 + $0x70] sm:$0xff] %v1927_v0 }
  0x9c   : > { %376 = vst [vmem:[#allocation2 + $0x78] sm:$0xff] %v1927_v0  ;;  %377 = vst [vmem:[#allocation2 + $0x28] sm:$0xff] %v1927_v0 }
  0x9d PF: > { %v1642_v1 = vld [vmem:[%s2204_s7 + $0x38] sm:$0xff]   ;;  %v1643_v2 = vld [vmem:[%s2204_s7 + $0x30] sm:$0xff]   ;;  %v1644_v3 = vld [vmem:[%s2204_s7 + $0x28] sm:$0xff]   ;;  %s2385_s16 = sld [smem:[#allocation15_spill]] }
  0x9e   : > { %1434 = vmatprep.subr.bf16.mxu0 %v1642_v1  ;;  %1466 = vmatprep.subr.bf16.mxu1 %v1642_v1  ;;  %v1645_v4 = vld [vmem:[%s2204_s7 + $0x20] sm:$0xff]   ;;  %v1646_v7 = vld [vmem:[%s2204_s7 + $0x18] sm:$0xff]   ;;  %v1647_v8 = vld [vmem:[%s2204_s7 + $0x10] sm:$0xff]  }
  0x9f   : > { %1435 = vmatpush3.bf16.msra.mxu0 %v1642_v1  ;;  %1474 = vmatpush3.bf16.msra.mxu1 %v1642_v1  ;;  %v1650_v5 = vld [vmem:[%s2195_s12] sm:$0xff]   ;;  %v1648_v9 = vld [vmem:[%s2204_s7 + $0x8] sm:$0xff]   ;;  %v1654_v13 = vld [vmem:[%s2195_s12 + $0x10] sm:$0xff]  }
  0xa0   : > { %1436 = vmatprep.subr.bf16.mxu0 %v1643_v2  ;;  %1467 = vmatprep.subr.bf16.mxu1 %v1643_v2  ;;  %v1651_v6 = vld [vmem:[%s2195_s12 + $0x20] sm:$0xff]   ;;  %v1652_v11 = vld [vmem:[%s2195_s12 + $0x8] sm:$0xff]   ;;  %v1655_v14 = vld [vmem:[%s2195_s12 + $0x30] sm:$0xff]  }
  0xa1   : > { %1450 = vmatprep.mubr.bf16.mxu0 %v1650_v5  ;;  %1458 = vmatprep.mubr.bf16.mxu1 %v1651_v6  ;;  %v1649_v10 = vld [vmem:[%s2204_s7] sm:$0xff]   ;;  %v1653_v12 = vld [vmem:[%s2195_s12 + $0x28] sm:$0xff]   ;;  %v1656_v15 = vld [vmem:[%s2195_s12 + $0x18] sm:$0xff]  }
  0xa2   : > { %v1657_v16 = vld [vmem:[%s2195_s12 + $0x38] sm:$0xff]   ;;  %v388_v18 = vld [vmem:[#allocation2 + $0x10] sm:$0xff]  ;;  %v386_v22 = vld [vmem:[#allocation2 + $0x40] sm:$0xff] }
  0xa3   : > { %1437 = vmatpush3.bf16.msra.mxu0 %v1643_v2  ;;  %1475 = vmatpush3.bf16.msra.mxu1 %v1643_v2  ;;  %v380_v17 = vld [vmem:[#allocation2 + $0x58] sm:$0xff]  ;;  %v378_v21 = vld [vmem:[#allocation2 + $0x30] sm:$0xff]  ;;  %v379_v33 = vld [vmem:[#allocation2] sm:$0xff]  ;;  %p1244_p12 = scmp.ne.s32.totalorder %s2385_s16, 1 }
  0xa4   : > { %1438 = vmatprep.subr.bf16.mxu0 %v1644_v3  ;;  %1468 = vmatprep.subr.bf16.mxu1 %v1644_v3  ;;  %v381_v27 = vld [vmem:[#allocation2 + $0x18] sm:$0xff]  ;;  %v387_v34 = vld [vmem:[#allocation2 + $0x20] sm:$0xff]  ;;  %v384_v39 = vld [vmem:[#allocation2 + $0x8] sm:$0xff]  ;;  %s2386_s14 = sld [smem:[#allocation23_spill]] (!%p1244_p12) }
  0xa5   : > { %v389_v28 = vld [vmem:[#allocation2 + $0x38] sm:$0xff]  ;;  %v382_v45 = vld [vmem:[#allocation2 + $0x50] sm:$0xff]  ;;  %v390_v46 = vld [vmem:[#allocation2 + $0x60] sm:$0xff] }
  0xa6   : > { %v392_v40 = vld [vmem:[#allocation2 + $0x78] sm:$0xff]  ;;  %v385_v51 = vld [vmem:[#allocation2 + $0x48] sm:$0xff]  ;;  %v391_v58 = vld [vmem:[#allocation2 + $0x70] sm:$0xff] }
  0xa7   : > { %1439 = vmatpush3.bf16.msra.mxu0 %v1644_v3  ;;  %1476 = vmatpush3.bf16.msra.mxu1 %v1644_v3  ;;  %v393_v52 = vld [vmem:[#allocation2 + $0x28] sm:$0xff] }
  0xa8   : > { %1440 = vmatprep.subr.bf16.mxu0 %v1645_v4  ;;  %1469 = vmatprep.subr.bf16.mxu1 %v1645_v4  ;;  %v383_v57 = vld [vmem:[#allocation2 + $0x68] sm:$0xff] }
  0xab   : > { %1441 = vmatpush3.bf16.msra.mxu0 %v1645_v4  ;;  %1477 = vmatpush3.bf16.msra.mxu1 %v1645_v4 }
  0xac   : > { %1442 = vmatprep.subr.bf16.mxu0 %v1646_v7  ;;  %1470 = vmatprep.subr.bf16.mxu1 %v1646_v7 }
  0xaf   : > { %1443 = vmatpush3.bf16.msra.mxu0 %v1646_v7  ;;  %1478 = vmatpush3.bf16.msra.mxu1 %v1646_v7 }
  0xb0   : > { %1444 = vmatprep.subr.bf16.mxu0 %v1647_v8  ;;  %1471 = vmatprep.subr.bf16.mxu1 %v1647_v8 }
  0xb3   : > { %1445 = vmatpush3.bf16.msra.mxu0 %v1647_v8  ;;  %1479 = vmatpush3.bf16.msra.mxu1 %v1647_v8 }
  0xb4   : > { %1446 = vmatprep.subr.bf16.mxu0 %v1648_v9  ;;  %1472 = vmatprep.subr.bf16.mxu1 %v1648_v9 }
  0xb7   : > { %1447 = vmatpush3.bf16.msra.mxu0 %v1648_v9  ;;  %1480 = vmatpush3.bf16.msra.mxu1 %v1648_v9 }
  0xb8   : > { %1448 = vmatprep.subr.bf16.mxu0 %v1649_v10  ;;  %1473 = vmatprep.subr.bf16.mxu1 %v1649_v10 }
  0xbb   : > { %1449 = vmatpush3.bf16.msra.mxu0 %v1649_v10  ;;  %1481 = vmatpush3.bf16.msra.mxu1 %v1649_v10 }
  0xbe   : > { %1451 = vmatmul.mubr.bf16.vlgmr.msra.gmra.mxu0 %v1652_v11  ;;  %1459 = vmatmul.mubr.bf16.vlgmr.msra.gmra.mxu1 %v1653_v12 }
  0xbf   : > { %1454 = vmatprep.mubr.bf16.mxu0 %v1654_v13  ;;  %1462 = vmatprep.mubr.bf16.mxu1 %v1655_v14 }
  0xc6   : > { %1455 = vmatmul.mubr.bf16.gmra.mxu0 %v1656_v15  ;;  %1463 = vmatmul.mubr.bf16.gmra.mxu1 %v1657_v16 }
 0x17e   : > { %v1452_v19 = vpop.f32.mrf.mxu0  ;;  %v1460_v20 = vpop.f32.mrf.mxu1 }
 0x17f   : > { %v621_v23 = vadd.f32 %v1452_v19, %v380_v17  ;;  %v629_v24 = vadd.f32 %v1460_v20, %v388_v18 }
 0x180   : > { %v556_v25 = vpop.f32.mrf.mxu0  ;;  %v588_v26 = vpop.f32.mrf.mxu1 }
 0x181   : > { %637 = vst [vmem:[#allocation2 + $0x58] sm:$0xff] %v621_v23  ;;  %645 = vst [vmem:[#allocation2 + $0x10] sm:$0xff] %v629_v24  ;;  %v619_v29 = vadd.f32 %v556_v25, %v378_v21  ;;  %v627_v30 = vadd.f32 %v588_v26, %v386_v22 }
 0x182   : > { %v1453_v31 = vpop.f32.mrf.mxu0  ;;  %v1461_v32 = vpop.f32.mrf.mxu1 }
 0x183   : > { %635 = vst [vmem:[#allocation2 + $0x30] sm:$0xff] %v619_v29  ;;  %643 = vst [vmem:[#allocation2 + $0x40] sm:$0xff] %v627_v30  ;;  %v622_v35 = vadd.f32 %v1453_v31, %v381_v27  ;;  %v630_v36 = vadd.f32 %v1461_v32, %v389_v28 }
 0x184   : > { %v559_v37 = vpop.f32.mrf.mxu0  ;;  %v591_v38 = vpop.f32.mrf.mxu1 }
 0x185   : > { %638 = vst [vmem:[#allocation2 + $0x18] sm:$0xff] %v622_v35  ;;  %646 = vst [vmem:[#allocation2 + $0x38] sm:$0xff] %v630_v36  ;;  %v620_v41 = vadd.f32 %v559_v37, %v379_v33  ;;  %v628_v42 = vadd.f32 %v591_v38, %v387_v34 }
 0x186   : > { %v1456_v43 = vpop.f32.mrf.mxu0  ;;  %v1464_v44 = vpop.f32.mrf.mxu1 }
 0x187   : > { %636 = vst [vmem:[#allocation2] sm:$0xff] %v620_v41  ;;  %644 = vst [vmem:[#allocation2 + $0x20] sm:$0xff] %v628_v42  ;;  %v625_v47 = vadd.f32 %v1456_v43, %v384_v39  ;;  %v633_v48 = vadd.f32 %v1464_v44, %v392_v40 }
 0x188   : > { %v572_v49 = vpop.f32.mrf.mxu0  ;;  %v604_v50 = vpop.f32.mrf.mxu1 }
 0x189   : > { %641 = vst [vmem:[#allocation2 + $0x8] sm:$0xff] %v625_v47  ;;  %649 = vst [vmem:[#allocation2 + $0x78] sm:$0xff] %v633_v48  ;;  %v623_v53 = vadd.f32 %v572_v49, %v382_v45  ;;  %v631_v54 = vadd.f32 %v604_v50, %v390_v46 }
 0x18a   : > { %v1457_v55 = vpop.f32.mrf.mxu0  ;;  %v1465_v56 = vpop.f32.mrf.mxu1 }
 0x18b   : > { %639 = vst [vmem:[#allocation2 + $0x50] sm:$0xff] %v623_v53  ;;  %647 = vst [vmem:[#allocation2 + $0x60] sm:$0xff] %v631_v54  ;;  %v626_v59 = vadd.f32 %v1457_v55, %v385_v51  ;;  %v634_v60 = vadd.f32 %v1465_v56, %v393_v52  ;;  %654 = sbr.rel (%p1244_p12) target bundleno = 665 (0x299), region = 64 }
 0x18c   : > { %v575_v61 = vpop.f32.mrf.mxu0  ;;  %v607_v62 = vpop.f32.mrf.mxu1 }
 0x18d   : > { %642 = vst [vmem:[#allocation2 + $0x48] sm:$0xff] %v626_v59  ;;  %650 = vst [vmem:[#allocation2 + $0x28] sm:$0xff] %v634_v60  ;;  %v624_v63 = vadd.f32 %v575_v61, %v383_v57  ;;  %v632_v0 = vadd.f32 %v607_v62, %v391_v58 }
 0x18f   : > { %640 = vst [vmem:[#allocation2 + $0x68] sm:$0xff] %v624_v63  ;;  %648 = vst [vmem:[#allocation2 + $0x70] sm:$0xff] %v632_v0 }
 0x190   : > { %v1658_v1 = vld [vmem:[#allocation8 + $0x78] sm:$0xff]   ;;  %v1660_v3 = vld [vmem:[#allocation8 + $0x70] sm:$0xff]   ;;  %v1662_v5 = vld [vmem:[#allocation8 + $0x68] sm:$0xff]  }
 0x191   : > { %v1659_v2 = vld [vmem:[#allocation8 + $0x38] sm:$0xff]   ;;  %1370 = vmatprep.subr.bf16.mxu0 %v1658_v1  ;;  %1482 = vmatprep.subr.bf16.mxu1 %v1658_v1  ;;  %v1661_v4 = vld [vmem:[#allocation8 + $0x30] sm:$0xff]   ;;  %v1663_v6 = vld [vmem:[#allocation8 + $0x28] sm:$0xff]  }
 0x192   : > { %1371 = vmatpush3.bf16.msra.mxu0 %v1659_v2  ;;  %1490 = vmatpush3.bf16.msra.mxu1 %v1659_v2  ;;  %v1664_v7 = vld [vmem:[#allocation8 + $0x60] sm:$0xff]   ;;  %v1666_v9 = vld [vmem:[#allocation8 + $0x58] sm:$0xff]   ;;  %v1668_v11 = vld [vmem:[#allocation8 + $0x50] sm:$0xff]  }
 0x193   : > { %1372 = vmatprep.subr.bf16.mxu0 %v1660_v3  ;;  %1483 = vmatprep.subr.bf16.mxu1 %v1660_v3  ;;  %v1665_v8 = vld [vmem:[#allocation8 + $0x20] sm:$0xff]   ;;  %v1667_v10 = vld [vmem:[#allocation8 + $0x18] sm:$0xff]   ;;  %v1669_v14 = vld [vmem:[#allocation8 + $0x10] sm:$0xff]  }
 0x194   : > { %v1674_v12 = vld [vmem:[%s2211_s5] sm:$0xff]   ;;  %v1670_v15 = vld [vmem:[#allocation8 + $0x48] sm:$0xff]   ;;  %v655_v19 = vld [vmem:[#allocation2 + $0x30] sm:$0xff] }
 0x195   : > { %v1675_v13 = vld [vmem:[%s2211_s5 + $0x20] sm:$0xff]   ;;  %910 = vmatprep.mubr.bf16.mxu0 %v1674_v12  ;;  %v1671_v16 = vld [vmem:[#allocation8 + $0x8] sm:$0xff]   ;;  %v657_v27 = vld [vmem:[#allocation2 + $0x58] sm:$0xff] }
 0x196   : > { %1373 = vmatpush3.bf16.msra.mxu0 %v1661_v4  ;;  %1491 = vmatpush3.bf16.msra.mxu1 %v1661_v4  ;;  %v1672_v17 = vld [vmem:[#allocation8 + $0x40] sm:$0xff]   ;;  %v1676_v25 = vld [vmem:[%s2211_s5 + $0x8] sm:$0xff]   ;;  %v658_v28 = vld [vmem:[#allocation2 + $0x18] sm:$0xff] }
 0x197   : > { %1374 = vmatprep.subr.bf16.mxu0 %v1662_v5  ;;  %1484 = vmatprep.subr.bf16.mxu1 %v1662_v5  ;;  %v1673_v18 = vld [vmem:[#allocation8] sm:$0xff]   ;;  %v1677_v26 = vld [vmem:[%s2211_s5 + $0x28] sm:$0xff]   ;;  %v665_v29 = vld [vmem:[#allocation2 + $0x10] sm:$0xff]  ;;  %v672_v31 = vpack.c.bf16 %v658_v28, %v657_v27 }
 0x198   : > { %942 = vmatprep.mubr.bf16.mxu1 %v1675_v13  ;;  %v656_v20 = vld [vmem:[#allocation2] sm:$0xff]  ;;  %v666_v30 = vld [vmem:[#allocation2 + $0x38] sm:$0xff]  ;;  %v1678_v33 = vld [vmem:[%s2211_s5 + $0x10] sm:$0xff]  }
 0x199   : > { %v663_v21 = vld [vmem:[#allocation2 + $0x40] sm:$0xff]  ;;  %v671_v23 = vpack.c.bf16 %v656_v20, %v655_v19  ;;  %v676_v32 = vpack.c.bf16 %v666_v30, %v665_v29  ;;  %v1679_v34 = vld [vmem:[%s2211_s5 + $0x30] sm:$0xff]   ;;  %v660_v36 = vld [vmem:[#allocation2 + $0x68] sm:$0xff] }
 0x19a   : > { %1375 = vmatpush3.bf16.msra.mxu0 %v1663_v6  ;;  %1492 = vmatpush3.bf16.msra.mxu1 %v1663_v6  ;;  %v664_v22 = vld [vmem:[#allocation2 + $0x20] sm:$0xff]  ;;  %v659_v35 = vld [vmem:[#allocation2 + $0x50] sm:$0xff]  ;;  %v1680_v41 = vld [vmem:[%s2211_s5 + $0x18] sm:$0xff]  }
 0x19b   : > { %1376 = vmatprep.subr.bf16.mxu0 %v1664_v7  ;;  %1485 = vmatprep.subr.bf16.mxu1 %v1664_v7  ;;  %v675_v24 = vpack.c.bf16 %v664_v22, %v663_v21  ;;  %v667_v37 = vld [vmem:[#allocation2 + $0x60] sm:$0xff]  ;;  %v668_v38 = vld [vmem:[#allocation2 + $0x70] sm:$0xff]  ;;  %v673_v39 = vpack.c.bf16 %v660_v36, %v659_v35  ;;  %v1681_v42 = vld [vmem:[%s2211_s5 + $0x38] sm:$0xff]  }
 0x19c   : > { %v677_v40 = vpack.c.bf16 %v668_v38, %v667_v37  ;;  %v661_v43 = vld [vmem:[#allocation2 + $0x8] sm:$0xff]  ;;  %v669_v45 = vld [vmem:[#allocation2 + $0x78] sm:$0xff]  ;;  %v2256_v53 = vld [vmem:[%s2386_s14] ss:$0 sm:$0xff] }
 0x19d   : > { %v662_v44 = vld [vmem:[#allocation2 + $0x48] sm:$0xff] }
 0x19e   : > { %1377 = vmatpush3.bf16.msra.mxu0 %v1665_v8  ;;  %1493 = vmatpush3.bf16.msra.mxu1 %v1665_v8  ;;  %v670_v46 = vld [vmem:[#allocation2 + $0x28] sm:$0xff]  ;;  %v674_v47 = vpack.c.bf16 %v662_v44, %v661_v43 }
 0x19f   : > { %1378 = vmatprep.subr.bf16.mxu0 %v1666_v9  ;;  %1486 = vmatprep.subr.bf16.mxu1 %v1666_v9  ;;  %v678_v48 = vpack.c.bf16 %v670_v46, %v669_v45 }
 0x1a2   : > { %1379 = vmatpush3.bf16.msra.mxu0 %v1667_v10  ;;  %1494 = vmatpush3.bf16.msra.mxu1 %v1667_v10 }
 0x1a3   : > { %1380 = vmatprep.subr.bf16.mxu0 %v1668_v11  ;;  %1487 = vmatprep.subr.bf16.mxu1 %v1668_v11 }
 0x1a6   : > { %1381 = vmatpush3.bf16.msra.mxu0 %v1669_v14  ;;  %1495 = vmatpush3.bf16.msra.mxu1 %v1669_v14 }
 0x1a7   : > { %1382 = vmatprep.subr.bf16.mxu0 %v1670_v15  ;;  %1488 = vmatprep.subr.bf16.mxu1 %v1670_v15 }
 0x1aa   : > { %1383 = vmatpush3.bf16.msra.mxu0 %v1671_v16  ;;  %1496 = vmatpush3.bf16.msra.mxu1 %v1671_v16 }
 0x1ab   : > { %1384 = vmatprep.subr.bf16.mxu0 %v1672_v17  ;;  %1489 = vmatprep.subr.bf16.mxu1 %v1672_v17 }
 0x1ae   : > { %1385 = vmatpush3.bf16.msra.mxu0 %v1673_v18  ;;  %1497 = vmatpush3.bf16.msra.mxu1 %v1673_v18 }
 0x1b1   : > { %911 = vmatmul.mubr.bf16.vlgmr.msra.gmra.mxu0 %v671_v23  ;;  %943 = vmatmul.mubr.bf16.vlgmr.msra.gmra.mxu1 %v675_v24 }
 0x1b2   : > { %918 = vmatprep.mubr.bf16.mxu0 %v1676_v25  ;;  %950 = vmatprep.mubr.bf16.mxu1 %v1677_v26 }
 0x1b9   : > { %919 = vmatmul.mubr.bf16.gmra.mxu0 %v672_v31  ;;  %951 = vmatmul.mubr.bf16.gmra.mxu1 %v676_v32 }
 0x1ba   : > { %926 = vmatprep.mubr.bf16.mxu0 %v1678_v33  ;;  %958 = vmatprep.mubr.bf16.mxu1 %v1679_v34 }
 0x1c1   : > { %927 = vmatmul.mubr.bf16.gmra.mxu0 %v673_v39  ;;  %959 = vmatmul.mubr.bf16.gmra.mxu1 %v677_v40 }
 0x1c2   : > { %934 = vmatprep.mubr.bf16.mxu0 %v1680_v41  ;;  %966 = vmatprep.mubr.bf16.mxu1 %v1681_v42 }
 0x1c9   : > { %935 = vmatmul.mubr.bf16.gmra.mxu0 %v674_v47  ;;  %967 = vmatmul.mubr.bf16.gmra.mxu1 %v678_v48 }
 0x271   : > { %v1386_v49 = vpop.f32.mrf.mxu0  ;;  %v1410_v50 = vpop.f32.mrf.mxu1 }
 0x273   : > { %v1387_v51 = vpop.f32.mrf.mxu0  ;;  %v1411_v52 = vpop.f32.mrf.mxu1 }
 0x274   : > { %v1388_v54 = vadd.f32 %v1387_v51, %v1386_v49  ;;  %v1412_v55 = vadd.f32 %v1411_v52, %v1410_v50 }
 0x275   : > { %v1389_v56 = vpop.f32.mrf.mxu0  ;;  %v1413_v57 = vpop.f32.mrf.mxu1 }
 0x276   : > { %v913_v58 = vadd.f32 %v1388_v54, %v2256_v53  ;;  %v945_v59 = vadd.f32 %v1412_v55, %v2256_v53 }
 0x277   : > { %v1390_v60 = vpop.f32.mrf.mxu0  ;;  %v1414_v61 = vpop.f32.mrf.mxu1 }
 0x278   : > { %v1391_v62 = vadd.f32 %v1390_v60, %v1389_v56  ;;  %v1415_v63 = vadd.f32 %v1414_v61, %v1413_v57  ;;  %v975_v4 = vmax.f32 %v913_v58, 0.0  ;;  %v983_v5 = vmax.f32 %v945_v59, 0.0 }
 0x279   : > { %v1392_v0 = vpop.f32.mrf.mxu0  ;;  %v1416_v1 = vpop.f32.mrf.mxu1 }
 0x27a   : > { %v916_v2 = vadd.f32 %v1391_v62, %v2256_v53  ;;  %v948_v3 = vadd.f32 %v1415_v63, %v2256_v53 }
 0x27b   : > { %v1393_v6 = vpop.f32.mrf.mxu0  ;;  %v1417_v7 = vpop.f32.mrf.mxu1 }
 0x27c   : > { %v976_v8 = vmax.f32 %v916_v2, 0.0  ;;  %v984_v9 = vmax.f32 %v948_v3, 0.0  ;;  %v1394_v10 = vadd.f32 %v1393_v6, %v1392_v0  ;;  %v1418_v11 = vadd.f32 %v1417_v7, %v1416_v1 }
 0x27d   : > { %v1395_v12 = vpop.f32.mrf.mxu0  ;;  %v1419_v13 = vpop.f32.mrf.mxu1 }
 0x27e   : > { %v1310_v14 = vpack.c.bf16 %v976_v8, %v975_v4  ;;  %v1330_v15 = vpack.c.bf16 %v984_v9, %v983_v5  ;;  %v921_v16 = vadd.f32 %v1394_v10, %v2256_v53  ;;  %v953_v17 = vadd.f32 %v1418_v11, %v2256_v53 }
 0x27f   : > { %v1396_v18 = vpop.f32.mrf.mxu0  ;;  %v1420_v19 = vpop.f32.mrf.mxu1 }
 0x280   : > { %1311 = vst [vmem:[%s2225_s13] sm:$0xff] %v1310_v14   ;;  %1350 = vst [vmem:[%s2225_s13 + $0x20] sm:$0xff] %v1330_v15   ;;  %v1397_v20 = vadd.f32 %v1396_v18, %v1395_v12  ;;  %v1421_v21 = vadd.f32 %v1420_v19, %v1419_v13  ;;  %v977_v26 = vmax.f32 %v921_v16, 0.0  ;;  %v985_v27 = vmax.f32 %v953_v17, 0.0 }
 0x281   : > { %v1398_v22 = vpop.f32.mrf.mxu0  ;;  %v1422_v23 = vpop.f32.mrf.mxu1 }
 0x282   : > { %v924_v24 = vadd.f32 %v1397_v20, %v2256_v53  ;;  %v956_v25 = vadd.f32 %v1421_v21, %v2256_v53 }
 0x283   : > { %v1399_v28 = vpop.f32.mrf.mxu0  ;;  %v1423_v29 = vpop.f32.mrf.mxu1 }
 0x284   : > { %v978_v30 = vmax.f32 %v924_v24, 0.0  ;;  %v986_v31 = vmax.f32 %v956_v25, 0.0  ;;  %v1400_v32 = vadd.f32 %v1399_v28, %v1398_v22  ;;  %v1424_v33 = vadd.f32 %v1423_v29, %v1422_v23 }
 0x285   : > { %v1401_v34 = vpop.f32.mrf.mxu0  ;;  %v1425_v35 = vpop.f32.mrf.mxu1 }
 0x286   : > { %v1315_v36 = vpack.c.bf16 %v978_v30, %v977_v26  ;;  %v1335_v37 = vpack.c.bf16 %v986_v31, %v985_v27  ;;  %v929_v38 = vadd.f32 %v1400_v32, %v2256_v53  ;;  %v961_v39 = vadd.f32 %v1424_v33, %v2256_v53 }
 0x287   : > { %v1402_v40 = vpop.f32.mrf.mxu0  ;;  %v1426_v41 = vpop.f32.mrf.mxu1 }
 0x288   : > { %1347 = vst [vmem:[%s2225_s13 + $0x8] sm:$0xff] %v1315_v36   ;;  %1351 = vst [vmem:[%s2225_s13 + $0x28] sm:$0xff] %v1335_v37   ;;  %v1403_v42 = vadd.f32 %v1402_v40, %v1401_v34  ;;  %v1427_v43 = vadd.f32 %v1426_v41, %v1425_v35  ;;  %v979_v48 = vmax.f32 %v929_v38, 0.0  ;;  %v987_v49 = vmax.f32 %v961_v39, 0.0 }
 0x289   : > { %v1404_v44 = vpop.f32.mrf.mxu0  ;;  %v1428_v45 = vpop.f32.mrf.mxu1 }
 0x28a   : > { %v932_v46 = vadd.f32 %v1403_v42, %v2256_v53  ;;  %v964_v47 = vadd.f32 %v1427_v43, %v2256_v53 }
 0x28b   : > { %v1405_v50 = vpop.f32.mrf.mxu0  ;;  %v1429_v51 = vpop.f32.mrf.mxu1 }
 0x28c   : > { %v980_v52 = vmax.f32 %v932_v46, 0.0  ;;  %v988_v54 = vmax.f32 %v964_v47, 0.0  ;;  %v1406_v55 = vadd.f32 %v1405_v50, %v1404_v44  ;;  %v1430_v56 = vadd.f32 %v1429_v51, %v1428_v45 }
 0x28d   : > { %v1407_v57 = vpop.f32.mrf.mxu0  ;;  %v1431_v58 = vpop.f32.mrf.mxu1 }
 0x28e   : > { %v1320_v59 = vpack.c.bf16 %v980_v52, %v979_v48  ;;  %v1340_v60 = vpack.c.bf16 %v988_v54, %v987_v49  ;;  %v937_v63 = vadd.f32 %v1406_v55, %v2256_v53  ;;  %v969_v0 = vadd.f32 %v1430_v56, %v2256_v53 }
 0x28f   : > { %v1408_v61 = vpop.f32.mrf.mxu0  ;;  %v1432_v62 = vpop.f32.mrf.mxu1 }
 0x290   : > { %1348 = vst [vmem:[%s2225_s13 + $0x10] sm:$0xff] %v1320_v59   ;;  %1352 = vst [vmem:[%s2225_s13 + $0x30] sm:$0xff] %v1340_v60   ;;  %v1409_v1 = vadd.f32 %v1408_v61, %v1407_v57  ;;  %v1433_v2 = vadd.f32 %v1432_v62, %v1431_v58  ;;  %v981_v5 = vmax.f32 %v937_v63, 0.0  ;;  %v989_v6 = vmax.f32 %v969_v0, 0.0 }
 0x292   : > { %v940_v3 = vadd.f32 %v1409_v1, %v2256_v53  ;;  %v972_v4 = vadd.f32 %v1433_v2, %v2256_v53 }
 0x294   : > { %v982_v7 = vmax.f32 %v940_v3, 0.0  ;;  %v990_v8 = vmax.f32 %v972_v4, 0.0 }
 0x296   : > { %v1325_v9 = vpack.c.bf16 %v982_v7, %v981_v5  ;;  %v1345_v10 = vpack.c.bf16 %v990_v8, %v989_v6 }
 0x298   : > { %1349 = vst [vmem:[%s2225_s13 + $0x18] sm:$0xff] %v1325_v9   ;;  %1353 = vst [vmem:[%s2225_s13 + $0x38] sm:$0xff] %v1345_v10  }
 0x299 PF: > { %s22_s6 = sadd.s32 1, %s1918_s6   ;;  %s2388_s10 = sld [smem:[#allocation14_spill]] }
 0x29a   : > { %p2283_p11 = scmp.ge.s32.totalorder %s22_s6, 6   ;;  %s2389_s23 = sld [smem:[#allocation19_spill]] }
 0x29b   : > { %s2390_s4 = sld [smem:[#allocation17_spill]]  ;;  %s2393_s18 = smov %s1870_s19 }
 0x29c   : > { %s2391_s7 = sld [smem:[#allocation18_spill]]  ;;  %s2394_s19 = smov %s1874_s20 }
 0x29d   : > { %s2395_s20 = smov %s2159_s9  ;;  %s2396_s21 = smov %s1882_s22 }
 0x29e   : > { %s2398_s24 = smov %s1894_s25  ;;  %s2399_s25 = smov %s1898_s26 }
 0x29f   : > { %s2397_s22 = smov %s2388_s10  ;;  %s2400_s26 = smov %s2123_s8 }
 0x2a0   : > { %s2401_s27 = smov %s1910_s29  ;;  %s2402_s28 = smov %s1914_s30 }
 0x2a1   : > { %s2403_s29 = smov %s2390_s4  ;;  %21 = sbr.rel (!%p2283_p11) target bundleno = 16 (0x10), region = 116 }
 0x2a2   : > { %s2404_s30 = smov %s2391_s7 }
 0x2a6   :  { %1093 = vsyncpa [#allocation4], 1 }
 0x2a7   :  { %1095 = vsyncpa [#allocation4 + $0x1], 1 }
 0x2a8   :  { %1096 = vsyncpa [#allocation6], 1 }
 0x2a9   :  { %1098 = vsyncpa [#allocation6 + $0x1], 1 }
 0x2aa   :  { %1099 = vsyncpa [#allocation9], 1 }

// kernel: sagenet_forward.4
= control target key start
LH: loop header
LB: loop body
LE: loop exit
PB: predicated region body
PF: predicated region fallthrough
CT: control target
= control target key end

     0   :  { %s1674_s18 = smov 0   ;;  %s1676_s19 = smov 0   ;;  %s1898_s0 = inlined_call_operand.vmem [shape: bf16[256,256], index: 0, kind: input, shape index: {}]   ;;  %s1899_s1 = inlined_call_operand.vmem [shape: bf16[256,128], index: 1, kind: input, shape index: {}, may-alias: {1,2}]   ;;  %s1900_s2 = inlined_call_operand.vmem [shape: bf16[256,128], index: 2, kind: input, shape index: {}, may-alias: {1,2}]   ;;  %s1901_s3 = inlined_call_operand.vmem [shape: bf16[256,128], index: 3, kind: input, shape index: {}]   ;;  %s1902_s4 = inlined_call_operand.vmem [shape: f32[1,128], index: 4, kind: input, shape index: {}]   ;;  %s1903_s5 = inlined_call_operand.vmem [shape: bf16[256,128], index: 5, kind: output, shape index: {}]  }
   0x1   :  { %s1678_s20 = smov 0   ;;  %s1680_s21 = smov 0  }
   0x2   :  { %s1682_s22 = smov 0   ;;  %s1684_s23 = smov 0  }
   0x3   :  { %s1686_s24 = smov 0  }
   0x4 LB: > { %s24_s25 = sadd.s32 1, %s1633_s22  ;;  %s27_s26 = sadd.s32 1, %s1637_s23  ;;  %s1641_s24 = sphi %s1686_s24, %s15_s24   ;;  %s1637_s23 = sphi %s1684_s23, %s1909_s23   ;;  %s1633_s22 = sphi %s1682_s22, %s1908_s22   ;;  %s1629_s21 = sphi %s1680_s21, %s1907_s21   ;;  %s1625_s20 = sphi %s1678_s20, %s1906_s20   ;;  %s1621_s19 = sphi %s1676_s19, %s1905_s19   ;;  %s1617_s18 = sphi %s1674_s18, %s1904_s18  }
   0x5   : > { %p25_p0 = scmp.ge.s32.totalorder %s24_s25, 2  ;;  %p43_p1 = scmp.ne.s32.totalorder %s1621_s19, %s1617_s18 }
   0x6   : > { %p44_p2 = scmp.eq.s32.totalorder %s1641_s24, 0  ;;  %s36_s30 = sadd.s32 1, %s1621_s19 }
   0x7   : > { %s1911_s25 = smov (%p25_p0, %s24_s25), 0  ;;  %s1913_s26 = smov (!%p25_p0, %s27_s26), %s1637_s23 }
   0x8   : > { %p45_p3 = por %p44_p2, %p43_p1  ;;  %p29_p4 = scmp.ge.s32.totalorder %s1913_s26, 2 }
   0x9   : > { %s32_s27 = ssub.s32 %s1633_s22, %s1911_s25  ;;  %p1208_p6 = scmp.ge.s32.totalorder %s1641_s24, 4 }
   0xa   : > { %s1915_s26 = smov (%p29_p4, %s1913_s26), 0 }
   0xb   : > { %s31_s28 = ssub.s32 %s1637_s23, %s1915_s26  ;;  %195 = sbr.rel (%p1208_p6) target bundleno = 32 (0x20), region = 24 }
   0xc   : > { %s33_s29 = sor.u32 %s32_s27, %s31_s28 }
   0xd   : > { %p34_p5 = scmp.eq.s32.totalorder %s33_s29, 0 }
   0xf   : > { %s1725_s6 = scalar_select %p34_p5, %s1621_s19, %s36_s30  }
  0x10   : > { %198 = sbr.rel (!%p45_p3) target bundleno = 32 (0x20), region = 28  ;;  %s200_s7 = sand.u32 (%p45_p3), 1, %s1621_s19  }
  0x11   : > { %s1282_s8 = sshll.u32 (%p45_p3), %s1637_s23, 5  ;;  %s1209_s9 = sshll.u32 (%p45_p3), %s200_s7, 6 }
  0x12   : > { %s205_s10 = sadd.s32 (%p45_p3), %s1633_s22, %s1282_s8  ;;  %s202_s15 = scalar_lea.vmem (%p45_p3), [#allocation3], %s1209_s9 }
  0x13   : > { %s1212_s11 = sshll.u32 (%p45_p3), %s205_s10, 2 }
  0x14   : > { %s1734_s14 = scalar_lea.vmem (%p45_p3), %s1898_s0, %s1212_s11 }
  0x15   : > { %v224_v0 = vld [vmem:[%s1734_s14] sm:$0xf]  ;;  %v226_v1 = vld [vmem:[%s1734_s14 + $0x8] sm:$0xf]  ;;  %v228_v2 = vld [vmem:[%s1734_s14 + $0x10] sm:$0xf] }
  0x16   : > { %225 = vst [vmem:[%s202_s15] sm:$0xf] %v224_v0  ;;  %227 = vst [vmem:[%s202_s15 + $0x4] sm:$0xf] %v226_v1  ;;  %v230_v3 = vld [vmem:[%s1734_s14 + $0x18] sm:$0xf] }
  0x17   : > { %229 = vst [vmem:[%s202_s15 + $0x8] sm:$0xf] %v228_v2  ;;  %v232_v4 = vld [vmem:[%s1734_s14 + $0x20] sm:$0xf]  ;;  %v234_v5 = vld [vmem:[%s1734_s14 + $0x28] sm:$0xf] }
  0x18   : > { %231 = vst [vmem:[%s202_s15 + $0xc] sm:$0xf] %v230_v3  ;;  %233 = vst [vmem:[%s202_s15 + $0x10] sm:$0xf] %v232_v4  ;;  %v236_v6 = vld [vmem:[%s1734_s14 + $0x30] sm:$0xf] }
  0x19   : > { %235 = vst [vmem:[%s202_s15 + $0x14] sm:$0xf] %v234_v5  ;;  %v238_v7 = vld [vmem:[%s1734_s14 + $0x38] sm:$0xf]  ;;  %v240_v8 = vld [vmem:[%s1734_s14 + $0x40] sm:$0xf] }
  0x1a   : > { %237 = vst [vmem:[%s202_s15 + $0x18] sm:$0xf] %v236_v6  ;;  %239 = vst [vmem:[%s202_s15 + $0x1c] sm:$0xf] %v238_v7  ;;  %v242_v9 = vld [vmem:[%s1734_s14 + $0x48] sm:$0xf] }
  0x1b   : > { %241 = vst [vmem:[%s202_s15 + $0x20] sm:$0xf] %v240_v8  ;;  %v244_v10 = vld [vmem:[%s1734_s14 + $0x50] sm:$0xf]  ;;  %v246_v11 = vld [vmem:[%s1734_s14 + $0x58] sm:$0xf] }
  0x1c   : > { %243 = vst [vmem:[%s202_s15 + $0x24] sm:$0xf] %v242_v9  ;;  %245 = vst [vmem:[%s202_s15 + $0x28] sm:$0xf] %v244_v10  ;;  %v248_v12 = vld [vmem:[%s1734_s14 + $0x60] sm:$0xf] }
  0x1d   : > { %247 = vst [vmem:[%s202_s15 + $0x2c] sm:$0xf] %v246_v11  ;;  %v250_v13 = vld [vmem:[%s1734_s14 + $0x68] sm:$0xf]  ;;  %v252_v14 = vld [vmem:[%s1734_s14 + $0x70] sm:$0xf] }
  0x1e   : > { %249 = vst [vmem:[%s202_s15 + $0x30] sm:$0xf] %v248_v12  ;;  %251 = vst [vmem:[%s202_s15 + $0x34] sm:$0xf] %v250_v13  ;;  %v254_v15 = vld [vmem:[%s1734_s14 + $0x78] sm:$0xf] }
  0x1f   : > { %253 = vst [vmem:[%s202_s15 + $0x38] sm:$0xf] %v252_v14  ;;  %255 = vst [vmem:[%s202_s15 + $0x3c] sm:$0xf] %v254_v15 }
  0x20 PF: > { %p1213_p7 = scmp.ge.s32.totalorder %s1641_s24, 1  ;;  %p328_p8 = scmp.lt.s32.totalorder %s1641_s24, 5 }
  0x22   : > { %p329_p9 = pnand %p1213_p7, %p328_p8 }
  0x23   : > { %s335_s16 = sand.u32 (!%p329_p9), 1, %s1617_s18   ;;  %s1215_s17 = sshll.u32 (!%p329_p9), %s1625_s20, 4 }
  0x24   : > { %332 = sbr.rel (%p329_p9) target bundleno = 566 (0x236), region = 77  ;;  %s1214_s27 = sshll.u32 (!%p329_p9), %s335_s16, 6 }
  0x25   : > { %p374_p10 = scmp.lt.s32.totalorder (!%p329_p9), %s1215_s17, 31  ;;  %s1217_s28 = sshll.u32 (!%p329_p9), %s1629_s21, 4 }
  0x26   : > { %p380_p11 = scmp.lt.s32.totalorder (!%p329_p9), %s1217_s28, 31  ;;  %s1772_s21 = scalar_lea.vmem (!%p329_p9), [#allocation3], %s1214_s27 }
  0x27   : > { %p1221_p12 = scmp.ne.s32.totalorder (!%p329_p9), %s1625_s20, 0 }
  0x29   : > { %s1917_s17 = smov (!%p374_p10, %s1215_s17), 31  ;;  %s1919_s28 = smov (!%p380_p11, %s1217_s28), 31 }
  0x2a   : > { %s1216_s29 = sshll.u32 %s1917_s17, 2  ;;  %s1218_s9 = sshll.u32 %s1919_s28, 2 }
  0x2b   : > { %s1760_s8 = scalar_lea.vmem %s1899_s1, %s1216_s29  ;;  %s1765_s12 = scalar_lea.vmem %s1900_s2, %s1218_s9 }
  0x2c   : > { %s1770_s14 = scalar_lea.vmem %s1903_s5, %s1218_s9  ;;  %395 = sbr.rel (%p1221_p12) target bundleno = 58 (0x3a), region = 85 }
  0x31   : > { %v1643_v16 = vmov 0.0  }
  0x32   : > { %396 = vst [vmem:[#allocation2 + $0x30] sm:$0xff] %v1643_v16  ;;  %397 = vst [vmem:[#allocation2] sm:$0xff] %v1643_v16 }
  0x33   : > { %398 = vst [vmem:[#allocation2 + $0x58] sm:$0xff] %v1643_v16  ;;  %399 = vst [vmem:[#allocation2 + $0x18] sm:$0xff] %v1643_v16 }
  0x34   : > { %400 = vst [vmem:[#allocation2 + $0x50] sm:$0xff] %v1643_v16  ;;  %401 = vst [vmem:[#allocation2 + $0x68] sm:$0xff] %v1643_v16 }
  0x35   : > { %402 = vst [vmem:[#allocation2 + $0x8] sm:$0xff] %v1643_v16  ;;  %403 = vst [vmem:[#allocation2 + $0x48] sm:$0xff] %v1643_v16 }
  0x36   : > { %404 = vst [vmem:[#allocation2 + $0x40] sm:$0xff] %v1643_v16  ;;  %405 = vst [vmem:[#allocation2 + $0x20] sm:$0xff] %v1643_v16 }
  0x37   : > { %406 = vst [vmem:[#allocation2 + $0x10] sm:$0xff] %v1643_v16  ;;  %407 = vst [vmem:[#allocation2 + $0x38] sm:$0xff] %v1643_v16 }
  0x38   : > { %408 = vst [vmem:[#allocation2 + $0x60] sm:$0xff] %v1643_v16  ;;  %409 = vst [vmem:[#allocation2 + $0x70] sm:$0xff] %v1643_v16 }
  0x39   : > { %410 = vst [vmem:[#allocation2 + $0x78] sm:$0xff] %v1643_v16  ;;  %411 = vst [vmem:[#allocation2 + $0x28] sm:$0xff] %v1643_v16 }
  0x3a PF: > { %v1547_v17 = vld [vmem:[%s1760_s8 + $0x38] sm:$0xff]   ;;  %v1548_v18 = vld [vmem:[%s1760_s8 + $0x30] sm:$0xff]   ;;  %v1549_v19 = vld [vmem:[%s1760_s8 + $0x28] sm:$0xff]   ;;  %p1238_p13 = scmp.ne.s32.totalorder %s1625_s20, 1 }
  0x3b   : > { %1426 = vmatprep.subr.bf16.mxu0 %v1547_v17  ;;  %1458 = vmatprep.subr.bf16.mxu1 %v1547_v17  ;;  %v1550_v20 = vld [vmem:[%s1760_s8 + $0x20] sm:$0xff]   ;;  %v1551_v23 = vld [vmem:[%s1760_s8 + $0x18] sm:$0xff]   ;;  %v1552_v24 = vld [vmem:[%s1760_s8 + $0x10] sm:$0xff]  }
  0x3c   : > { %1427 = vmatpush3.bf16.msra.mxu0 %v1547_v17  ;;  %1466 = vmatpush3.bf16.msra.mxu1 %v1547_v17  ;;  %v1555_v21 = vld [vmem:[%s1772_s21] sm:$0xff]   ;;  %v1553_v25 = vld [vmem:[%s1760_s8 + $0x8] sm:$0xff]   ;;  %v1559_v29 = vld [vmem:[%s1772_s21 + $0x10] sm:$0xff]  }
  0x3d   : > { %1428 = vmatprep.subr.bf16.mxu0 %v1548_v18  ;;  %1459 = vmatprep.subr.bf16.mxu1 %v1548_v18  ;;  %v1556_v22 = vld [vmem:[%s1772_s21 + $0x20] sm:$0xff]   ;;  %v1557_v27 = vld [vmem:[%s1772_s21 + $0x8] sm:$0xff]   ;;  %v1560_v30 = vld [vmem:[%s1772_s21 + $0x30] sm:$0xff]  }
  0x3e   : > { %1442 = vmatprep.mubr.bf16.mxu0 %v1555_v21  ;;  %1450 = vmatprep.mubr.bf16.mxu1 %v1556_v22  ;;  %v1554_v26 = vld [vmem:[%s1760_s8] sm:$0xff]   ;;  %v1558_v28 = vld [vmem:[%s1772_s21 + $0x28] sm:$0xff]   ;;  %v1561_v31 = vld [vmem:[%s1772_s21 + $0x18] sm:$0xff]  }
  0x3f   : > { %v1562_v32 = vld [vmem:[%s1772_s21 + $0x38] sm:$0xff]   ;;  %v422_v34 = vld [vmem:[#allocation2 + $0x10] sm:$0xff]  ;;  %v420_v38 = vld [vmem:[#allocation2 + $0x40] sm:$0xff] }
  0x40   : > { %1429 = vmatpush3.bf16.msra.mxu0 %v1548_v18  ;;  %1467 = vmatpush3.bf16.msra.mxu1 %v1548_v18  ;;  %v414_v33 = vld [vmem:[#allocation2 + $0x58] sm:$0xff]  ;;  %v412_v37 = vld [vmem:[#allocation2 + $0x30] sm:$0xff]  ;;  %v413_v49 = vld [vmem:[#allocation2] sm:$0xff] }
  0x41   : > { %1430 = vmatprep.subr.bf16.mxu0 %v1549_v19  ;;  %1460 = vmatprep.subr.bf16.mxu1 %v1549_v19  ;;  %v415_v43 = vld [vmem:[#allocation2 + $0x18] sm:$0xff]  ;;  %v421_v50 = vld [vmem:[#allocation2 + $0x20] sm:$0xff]  ;;  %v418_v55 = vld [vmem:[#allocation2 + $0x8] sm:$0xff] }
  0x42   : > { %v423_v44 = vld [vmem:[#allocation2 + $0x38] sm:$0xff]  ;;  %v416_v61 = vld [vmem:[#allocation2 + $0x50] sm:$0xff]  ;;  %v424_v62 = vld [vmem:[#allocation2 + $0x60] sm:$0xff] }
  0x43   : > { %v426_v56 = vld [vmem:[#allocation2 + $0x78] sm:$0xff]  ;;  %v419_v3 = vld [vmem:[#allocation2 + $0x48] sm:$0xff]  ;;  %v425_v10 = vld [vmem:[#allocation2 + $0x70] sm:$0xff] }
  0x44   : > { %1431 = vmatpush3.bf16.msra.mxu0 %v1549_v19  ;;  %1468 = vmatpush3.bf16.msra.mxu1 %v1549_v19  ;;  %v427_v4 = vld [vmem:[#allocation2 + $0x28] sm:$0xff] }
  0x45   : > { %1432 = vmatprep.subr.bf16.mxu0 %v1550_v20  ;;  %1461 = vmatprep.subr.bf16.mxu1 %v1550_v20  ;;  %v417_v9 = vld [vmem:[#allocation2 + $0x68] sm:$0xff] }
  0x48   : > { %1433 = vmatpush3.bf16.msra.mxu0 %v1550_v20  ;;  %1469 = vmatpush3.bf16.msra.mxu1 %v1550_v20 }
  0x49   : > { %1434 = vmatprep.subr.bf16.mxu0 %v1551_v23  ;;  %1462 = vmatprep.subr.bf16.mxu1 %v1551_v23 }
  0x4c   : > { %1435 = vmatpush3.bf16.msra.mxu0 %v1551_v23  ;;  %1470 = vmatpush3.bf16.msra.mxu1 %v1551_v23 }
  0x4d   : > { %1436 = vmatprep.subr.bf16.mxu0 %v1552_v24  ;;  %1463 = vmatprep.subr.bf16.mxu1 %v1552_v24 }
  0x50   : > { %1437 = vmatpush3.bf16.msra.mxu0 %v1552_v24  ;;  %1471 = vmatpush3.bf16.msra.mxu1 %v1552_v24 }
  0x51   : > { %1438 = vmatprep.subr.bf16.mxu0 %v1553_v25  ;;  %1464 = vmatprep.subr.bf16.mxu1 %v1553_v25 }
  0x54   : > { %1439 = vmatpush3.bf16.msra.mxu0 %v1553_v25  ;;  %1472 = vmatpush3.bf16.msra.mxu1 %v1553_v25 }
  0x55   : > { %1440 = vmatprep.subr.bf16.mxu0 %v1554_v26  ;;  %1465 = vmatprep.subr.bf16.mxu1 %v1554_v26 }
  0x58   : > { %1441 = vmatpush3.bf16.msra.mxu0 %v1554_v26  ;;  %1473 = vmatpush3.bf16.msra.mxu1 %v1554_v26 }
  0x5b   : > { %1443 = vmatmul.mubr.bf16.vlgmr.msra.gmra.mxu0 %v1557_v27  ;;  %1451 = vmatmul.mubr.bf16.vlgmr.msra.gmra.mxu1 %v1558_v28 }
  0x5c   : > { %1446 = vmatprep.mubr.bf16.mxu0 %v1559_v29  ;;  %1454 = vmatprep.mubr.bf16.mxu1 %v1560_v30 }
  0x63   : > { %1447 = vmatmul.mubr.bf16.gmra.mxu0 %v1561_v31  ;;  %1455 = vmatmul.mubr.bf16.gmra.mxu1 %v1562_v32 }
 0x11b   : > { %v1444_v35 = vpop.f32.mrf.mxu0  ;;  %v1452_v36 = vpop.f32.mrf.mxu1 }
 0x11c   : > { %v655_v39 = vadd.f32 %v1444_v35, %v414_v33  ;;  %v663_v40 = vadd.f32 %v1452_v36, %v422_v34 }
 0x11d   : > { %v590_v41 = vpop.f32.mrf.mxu0  ;;  %v622_v42 = vpop.f32.mrf.mxu1 }
 0x11e   : > { %671 = vst [vmem:[#allocation2 + $0x58] sm:$0xff] %v655_v39  ;;  %679 = vst [vmem:[#allocation2 + $0x10] sm:$0xff] %v663_v40  ;;  %v653_v45 = vadd.f32 %v590_v41, %v412_v37  ;;  %v661_v46 = vadd.f32 %v622_v42, %v420_v38 }
 0x11f   : > { %v1445_v47 = vpop.f32.mrf.mxu0  ;;  %v1453_v48 = vpop.f32.mrf.mxu1 }
 0x120   : > { %669 = vst [vmem:[#allocation2 + $0x30] sm:$0xff] %v653_v45  ;;  %677 = vst [vmem:[#allocation2 + $0x40] sm:$0xff] %v661_v46  ;;  %v656_v51 = vadd.f32 %v1445_v47, %v415_v43  ;;  %v664_v52 = vadd.f32 %v1453_v48, %v423_v44 }
 0x121   : > { %v593_v53 = vpop.f32.mrf.mxu0  ;;  %v625_v54 = vpop.f32.mrf.mxu1 }
 0x122   : > { %672 = vst [vmem:[#allocation2 + $0x18] sm:$0xff] %v656_v51  ;;  %680 = vst [vmem:[#allocation2 + $0x38] sm:$0xff] %v664_v52  ;;  %v654_v57 = vadd.f32 %v593_v53, %v413_v49  ;;  %v662_v58 = vadd.f32 %v625_v54, %v421_v50 }
 0x123   : > { %v1448_v59 = vpop.f32.mrf.mxu0  ;;  %v1456_v60 = vpop.f32.mrf.mxu1 }
 0x124   : > { %670 = vst [vmem:[#allocation2] sm:$0xff] %v654_v57  ;;  %678 = vst [vmem:[#allocation2 + $0x20] sm:$0xff] %v662_v58  ;;  %v659_v63 = vadd.f32 %v1448_v59, %v418_v55  ;;  %v667_v0 = vadd.f32 %v1456_v60, %v426_v56 }
 0x125   : > { %v606_v1 = vpop.f32.mrf.mxu0  ;;  %v638_v2 = vpop.f32.mrf.mxu1 }
 0x126   : > { %675 = vst [vmem:[#allocation2 + $0x8] sm:$0xff] %v659_v63  ;;  %683 = vst [vmem:[#allocation2 + $0x78] sm:$0xff] %v667_v0  ;;  %v657_v5 = vadd.f32 %v606_v1, %v416_v61  ;;  %v665_v6 = vadd.f32 %v638_v2, %v424_v62 }
 0x127   : > { %v1449_v7 = vpop.f32.mrf.mxu0  ;;  %v1457_v8 = vpop.f32.mrf.mxu1 }
 0x128   : > { %673 = vst [vmem:[#allocation2 + $0x50] sm:$0xff] %v657_v5  ;;  %681 = vst [vmem:[#allocation2 + $0x60] sm:$0xff] %v665_v6  ;;  %v660_v11 = vadd.f32 %v1449_v7, %v419_v3  ;;  %v668_v12 = vadd.f32 %v1457_v8, %v427_v4  ;;  %688 = sbr.rel (%p1238_p13) target bundleno = 566 (0x236), region = 89 }
 0x129   : > { %v609_v13 = vpop.f32.mrf.mxu0  ;;  %v641_v14 = vpop.f32.mrf.mxu1 }
 0x12a   : > { %676 = vst [vmem:[#allocation2 + $0x48] sm:$0xff] %v660_v11  ;;  %684 = vst [vmem:[#allocation2 + $0x28] sm:$0xff] %v668_v12  ;;  %v658_v15 = vadd.f32 %v609_v13, %v417_v9  ;;  %v666_v16 = vadd.f32 %v641_v14, %v425_v10 }
 0x12c   : > { %674 = vst [vmem:[#allocation2 + $0x68] sm:$0xff] %v658_v15  ;;  %682 = vst [vmem:[#allocation2 + $0x70] sm:$0xff] %v666_v16 }
 0x12d   : > { %v1563_v17 = vld [vmem:[%s1901_s3 + $0x78] sm:$0xff]   ;;  %v1565_v19 = vld [vmem:[%s1901_s3 + $0x70] sm:$0xff]   ;;  %v1567_v21 = vld [vmem:[%s1901_s3 + $0x68] sm:$0xff]  }
 0x12e   : > { %v1564_v18 = vld [vmem:[%s1901_s3 + $0x38] sm:$0xff]   ;;  %1362 = vmatprep.subr.bf16.mxu0 %v1563_v17  ;;  %1474 = vmatprep.subr.bf16.mxu1 %v1563_v17  ;;  %v1566_v20 = vld [vmem:[%s1901_s3 + $0x30] sm:$0xff]   ;;  %v1568_v22 = vld [vmem:[%s1901_s3 + $0x28] sm:$0xff]  }
 0x12f   : > { %1363 = vmatpush3.bf16.msra.mxu0 %v1564_v18  ;;  %1482 = vmatpush3.bf16.msra.mxu1 %v1564_v18  ;;  %v1569_v23 = vld [vmem:[%s1901_s3 + $0x60] sm:$0xff]   ;;  %v1571_v25 = vld [vmem:[%s1901_s3 + $0x58] sm:$0xff]   ;;  %v1573_v27 = vld [vmem:[%s1901_s3 + $0x50] sm:$0xff]  }
 0x130   : > { %1364 = vmatprep.subr.bf16.mxu0 %v1565_v19  ;;  %1475 = vmatprep.subr.bf16.mxu1 %v1565_v19  ;;  %v1570_v24 = vld [vmem:[%s1901_s3 + $0x20] sm:$0xff]   ;;  %v1572_v26 = vld [vmem:[%s1901_s3 + $0x18] sm:$0xff]   ;;  %v1574_v30 = vld [vmem:[%s1901_s3 + $0x10] sm:$0xff]  }
 0x131   : > { %v1579_v28 = vld [vmem:[%s1765_s12] sm:$0xff]   ;;  %v1575_v31 = vld [vmem:[%s1901_s3 + $0x48] sm:$0xff]   ;;  %v689_v35 = vld [vmem:[#allocation2 + $0x30] sm:$0xff] }
 0x132   : > { %v1580_v29 = vld [vmem:[%s1765_s12 + $0x20] sm:$0xff]   ;;  %944 = vmatprep.mubr.bf16.mxu0 %v1579_v28  ;;  %v1576_v32 = vld [vmem:[%s1901_s3 + $0x8] sm:$0xff]   ;;  %v691_v43 = vld [vmem:[#allocation2 + $0x58] sm:$0xff] }
 0x133   : > { %1365 = vmatpush3.bf16.msra.mxu0 %v1566_v20  ;;  %1483 = vmatpush3.bf16.msra.mxu1 %v1566_v20  ;;  %v1577_v33 = vld [vmem:[%s1901_s3 + $0x40] sm:$0xff]   ;;  %v1581_v41 = vld [vmem:[%s1765_s12 + $0x8] sm:$0xff]   ;;  %v692_v44 = vld [vmem:[#allocation2 + $0x18] sm:$0xff] }
 0x134   : > { %1366 = vmatprep.subr.bf16.mxu0 %v1567_v21  ;;  %1476 = vmatprep.subr.bf16.mxu1 %v1567_v21  ;;  %v1578_v34 = vld [vmem:[%s1901_s3] sm:$0xff]   ;;  %v1582_v42 = vld [vmem:[%s1765_s12 + $0x28] sm:$0xff]   ;;  %v699_v45 = vld [vmem:[#allocation2 + $0x10] sm:$0xff]  ;;  %v706_v47 = vpack.c.bf16 %v692_v44, %v691_v43 }
 0x135   : > { %976 = vmatprep.mubr.bf16.mxu1 %v1580_v29  ;;  %v690_v36 = vld [vmem:[#allocation2] sm:$0xff]  ;;  %v700_v46 = vld [vmem:[#allocation2 + $0x38] sm:$0xff]  ;;  %v1583_v49 = vld [vmem:[%s1765_s12 + $0x10] sm:$0xff]  }
 0x136   : > { %v697_v37 = vld [vmem:[#allocation2 + $0x40] sm:$0xff]  ;;  %v705_v39 = vpack.c.bf16 %v690_v36, %v689_v35  ;;  %v710_v48 = vpack.c.bf16 %v700_v46, %v699_v45  ;;  %v1584_v50 = vld [vmem:[%s1765_s12 + $0x30] sm:$0xff]   ;;  %v694_v52 = vld [vmem:[#allocation2 + $0x68] sm:$0xff] }
 0x137   : > { %1367 = vmatpush3.bf16.msra.mxu0 %v1568_v22  ;;  %1484 = vmatpush3.bf16.msra.mxu1 %v1568_v22  ;;  %v698_v38 = vld [vmem:[#allocation2 + $0x20] sm:$0xff]  ;;  %v693_v51 = vld [vmem:[#allocation2 + $0x50] sm:$0xff]  ;;  %v1585_v57 = vld [vmem:[%s1765_s12 + $0x18] sm:$0xff]  }
 0x138   : > { %1368 = vmatprep.subr.bf16.mxu0 %v1569_v23  ;;  %1477 = vmatprep.subr.bf16.mxu1 %v1569_v23  ;;  %v709_v40 = vpack.c.bf16 %v698_v38, %v697_v37  ;;  %v701_v53 = vld [vmem:[#allocation2 + $0x60] sm:$0xff]  ;;  %v702_v54 = vld [vmem:[#allocation2 + $0x70] sm:$0xff]  ;;  %v707_v55 = vpack.c.bf16 %v694_v52, %v693_v51  ;;  %v1586_v58 = vld [vmem:[%s1765_s12 + $0x38] sm:$0xff]  }
 0x139   : > { %v711_v56 = vpack.c.bf16 %v702_v54, %v701_v53  ;;  %v695_v59 = vld [vmem:[#allocation2 + $0x8] sm:$0xff]  ;;  %v703_v61 = vld [vmem:[#allocation2 + $0x78] sm:$0xff]  ;;  %v1851_v5 = vld [vmem:[%s1902_s4] ss:$0 sm:$0xff] }
 0x13a   : > { %v696_v60 = vld [vmem:[#allocation2 + $0x48] sm:$0xff] }
 0x13b   : > { %1369 = vmatpush3.bf16.msra.mxu0 %v1570_v24  ;;  %1485 = vmatpush3.bf16.msra.mxu1 %v1570_v24  ;;  %v704_v62 = vld [vmem:[#allocation2 + $0x28] sm:$0xff]  ;;  %v708_v63 = vpack.c.bf16 %v696_v60, %v695_v59 }
 0x13c   : > { %1370 = vmatprep.subr.bf16.mxu0 %v1571_v25  ;;  %1478 = vmatprep.subr.bf16.mxu1 %v1571_v25  ;;  %v712_v0 = vpack.c.bf16 %v704_v62, %v703_v61 }
 0x13f   : > { %1371 = vmatpush3.bf16.msra.mxu0 %v1572_v26  ;;  %1486 = vmatpush3.bf16.msra.mxu1 %v1572_v26 }
 0x140   : > { %1372 = vmatprep.subr.bf16.mxu0 %v1573_v27  ;;  %1479 = vmatprep.subr.bf16.mxu1 %v1573_v27 }
 0x143   : > { %1373 = vmatpush3.bf16.msra.mxu0 %v1574_v30  ;;  %1487 = vmatpush3.bf16.msra.mxu1 %v1574_v30 }
 0x144   : > { %1374 = vmatprep.subr.bf16.mxu0 %v1575_v31  ;;  %1480 = vmatprep.subr.bf16.mxu1 %v1575_v31 }
 0x147   : > { %1375 = vmatpush3.bf16.msra.mxu0 %v1576_v32  ;;  %1488 = vmatpush3.bf16.msra.mxu1 %v1576_v32 }
 0x148   : > { %1376 = vmatprep.subr.bf16.mxu0 %v1577_v33  ;;  %1481 = vmatprep.subr.bf16.mxu1 %v1577_v33 }
 0x14b   : > { %1377 = vmatpush3.bf16.msra.mxu0 %v1578_v34  ;;  %1489 = vmatpush3.bf16.msra.mxu1 %v1578_v34 }
 0x14e   : > { %945 = vmatmul.mubr.bf16.vlgmr.msra.gmra.mxu0 %v705_v39  ;;  %977 = vmatmul.mubr.bf16.vlgmr.msra.gmra.mxu1 %v709_v40 }
 0x14f   : > { %952 = vmatprep.mubr.bf16.mxu0 %v1581_v41  ;;  %984 = vmatprep.mubr.bf16.mxu1 %v1582_v42 }
 0x156   : > { %953 = vmatmul.mubr.bf16.gmra.mxu0 %v706_v47  ;;  %985 = vmatmul.mubr.bf16.gmra.mxu1 %v710_v48 }
 0x157   : > { %960 = vmatprep.mubr.bf16.mxu0 %v1583_v49  ;;  %992 = vmatprep.mubr.bf16.mxu1 %v1584_v50 }
 0x15e   : > { %961 = vmatmul.mubr.bf16.gmra.mxu0 %v707_v55  ;;  %993 = vmatmul.mubr.bf16.gmra.mxu1 %v711_v56 }
 0x15f   : > { %968 = vmatprep.mubr.bf16.mxu0 %v1585_v57  ;;  %1000 = vmatprep.mubr.bf16.mxu1 %v1586_v58 }
 0x166   : > { %969 = vmatmul.mubr.bf16.gmra.mxu0 %v708_v63  ;;  %1001 = vmatmul.mubr.bf16.gmra.mxu1 %v712_v0 }
 0x20e   : > { %v1378_v1 = vpop.f32.mrf.mxu0  ;;  %v1402_v2 = vpop.f32.mrf.mxu1 }
 0x210   : > { %v1379_v3 = vpop.f32.mrf.mxu0  ;;  %v1403_v4 = vpop.f32.mrf.mxu1 }
 0x211   : > { %v1380_v6 = vadd.f32 %v1379_v3, %v1378_v1  ;;  %v1404_v7 = vadd.f32 %v1403_v4, %v1402_v2 }
 0x212   : > { %v1381_v8 = vpop.f32.mrf.mxu0  ;;  %v1405_v9 = vpop.f32.mrf.mxu1 }
 0x213   : > { %v947_v10 = vadd.f32 %v1380_v6, %v1851_v5  ;;  %v979_v11 = vadd.f32 %v1404_v7, %v1851_v5 }
 0x214   : > { %v1382_v12 = vpop.f32.mrf.mxu0  ;;  %v1406_v13 = vpop.f32.mrf.mxu1 }
 0x215   : > { %v1383_v14 = vadd.f32 %v1382_v12, %v1381_v8  ;;  %v1407_v15 = vadd.f32 %v1406_v13, %v1405_v9  ;;  %v1009_v20 = vmax.f32 %v947_v10, 0.0  ;;  %v1017_v21 = vmax.f32 %v979_v11, 0.0 }
 0x216   : > { %v1384_v16 = vpop.f32.mrf.mxu0  ;;  %v1408_v17 = vpop.f32.mrf.mxu1 }
 0x217   : > { %v950_v18 = vadd.f32 %v1383_v14, %v1851_v5  ;;  %v982_v19 = vadd.f32 %v1407_v15, %v1851_v5 }
 0x218   : > { %v1385_v22 = vpop.f32.mrf.mxu0  ;;  %v1409_v23 = vpop.f32.mrf.mxu1 }
 0x219   : > { %v1010_v24 = vmax.f32 %v950_v18, 0.0  ;;  %v1018_v25 = vmax.f32 %v982_v19, 0.0  ;;  %v1386_v26 = vadd.f32 %v1385_v22, %v1384_v16  ;;  %v1410_v27 = vadd.f32 %v1409_v23, %v1408_v17 }
 0x21a   : > { %v1387_v28 = vpop.f32.mrf.mxu0  ;;  %v1411_v29 = vpop.f32.mrf.mxu1 }
 0x21b   : > { %v1302_v30 = vpack.c.bf16 %v1010_v24, %v1009_v20  ;;  %v1322_v31 = vpack.c.bf16 %v1018_v25, %v1017_v21  ;;  %v955_v32 = vadd.f32 %v1386_v26, %v1851_v5  ;;  %v987_v33 = vadd.f32 %v1410_v27, %v1851_v5 }
 0x21c   : > { %v1388_v34 = vpop.f32.mrf.mxu0  ;;  %v1412_v35 = vpop.f32.mrf.mxu1 }
 0x21d   : > { %1303 = vst [vmem:[%s1770_s14] sm:$0xff] %v1302_v30   ;;  %1342 = vst [vmem:[%s1770_s14 + $0x20] sm:$0xff] %v1322_v31   ;;  %v1389_v36 = vadd.f32 %v1388_v34, %v1387_v28  ;;  %v1413_v37 = vadd.f32 %v1412_v35, %v1411_v29  ;;  %v1011_v42 = vmax.f32 %v955_v32, 0.0  ;;  %v1019_v43 = vmax.f32 %v987_v33, 0.0 }
 0x21e   : > { %v1390_v38 = vpop.f32.mrf.mxu0  ;;  %v1414_v39 = vpop.f32.mrf.mxu1 }
 0x21f   : > { %v958_v40 = vadd.f32 %v1389_v36, %v1851_v5  ;;  %v990_v41 = vadd.f32 %v1413_v37, %v1851_v5 }
 0x220   : > { %v1391_v44 = vpop.f32.mrf.mxu0  ;;  %v1415_v45 = vpop.f32.mrf.mxu1 }
 0x221   : > { %v1012_v46 = vmax.f32 %v958_v40, 0.0  ;;  %v1020_v47 = vmax.f32 %v990_v41, 0.0  ;;  %v1392_v48 = vadd.f32 %v1391_v44, %v1390_v38  ;;  %v1416_v49 = vadd.f32 %v1415_v45, %v1414_v39 }
 0x222   : > { %v1393_v50 = vpop.f32.mrf.mxu0  ;;  %v1417_v51 = vpop.f32.mrf.mxu1 }
 0x223   : > { %v1307_v52 = vpack.c.bf16 %v1012_v46, %v1011_v42  ;;  %v1327_v53 = vpack.c.bf16 %v1020_v47, %v1019_v43  ;;  %v963_v54 = vadd.f32 %v1392_v48, %v1851_v5  ;;  %v995_v55 = vadd.f32 %v1416_v49, %v1851_v5 }
 0x224   : > { %v1394_v56 = vpop.f32.mrf.mxu0  ;;  %v1418_v57 = vpop.f32.mrf.mxu1 }
 0x225   : > { %1339 = vst [vmem:[%s1770_s14 + $0x8] sm:$0xff] %v1307_v52   ;;  %1343 = vst [vmem:[%s1770_s14 + $0x28] sm:$0xff] %v1327_v53   ;;  %v1395_v58 = vadd.f32 %v1394_v56, %v1393_v50  ;;  %v1419_v59 = vadd.f32 %v1418_v57, %v1417_v51  ;;  %v1013_v0 = vmax.f32 %v963_v54, 0.0  ;;  %v1021_v1 = vmax.f32 %v995_v55, 0.0 }
 0x226   : > { %v1396_v60 = vpop.f32.mrf.mxu0  ;;  %v1420_v61 = vpop.f32.mrf.mxu1 }
 0x227   : > { %v966_v62 = vadd.f32 %v1395_v58, %v1851_v5  ;;  %v998_v63 = vadd.f32 %v1419_v59, %v1851_v5 }
 0x228   : > { %v1397_v2 = vpop.f32.mrf.mxu0  ;;  %v1421_v3 = vpop.f32.mrf.mxu1 }
 0x229   : > { %v1014_v4 = vmax.f32 %v966_v62, 0.0  ;;  %v1022_v6 = vmax.f32 %v998_v63, 0.0  ;;  %v1398_v7 = vadd.f32 %v1397_v2, %v1396_v60  ;;  %v1422_v8 = vadd.f32 %v1421_v3, %v1420_v61 }
 0x22a   : > { %v1399_v9 = vpop.f32.mrf.mxu0  ;;  %v1423_v10 = vpop.f32.mrf.mxu1 }
 0x22b   : > { %v1312_v11 = vpack.c.bf16 %v1014_v4, %v1013_v0  ;;  %v1332_v12 = vpack.c.bf16 %v1022_v6, %v1021_v1  ;;  %v971_v15 = vadd.f32 %v1398_v7, %v1851_v5  ;;  %v1003_v16 = vadd.f32 %v1422_v8, %v1851_v5 }
 0x22c   : > { %v1400_v13 = vpop.f32.mrf.mxu0  ;;  %v1424_v14 = vpop.f32.mrf.mxu1 }
 0x22d   : > { %1340 = vst [vmem:[%s1770_s14 + $0x10] sm:$0xff] %v1312_v11   ;;  %1344 = vst [vmem:[%s1770_s14 + $0x30] sm:$0xff] %v1332_v12   ;;  %v1401_v17 = vadd.f32 %v1400_v13, %v1399_v9  ;;  %v1425_v18 = vadd.f32 %v1424_v14, %v1423_v10  ;;  %v1015_v21 = vmax.f32 %v971_v15, 0.0  ;;  %v1023_v22 = vmax.f32 %v1003_v16, 0.0 }
 0x22f   : > { %v974_v19 = vadd.f32 %v1401_v17, %v1851_v5  ;;  %v1006_v20 = vadd.f32 %v1425_v18, %v1851_v5 }
 0x231   : > { %v1016_v23 = vmax.f32 %v974_v19, 0.0  ;;  %v1024_v24 = vmax.f32 %v1006_v20, 0.0 }
 0x233   : > { %v1317_v25 = vpack.c.bf16 %v1016_v23, %v1015_v21  ;;  %v1337_v26 = vpack.c.bf16 %v1024_v24, %v1023_v22 }
 0x235   : > { %1341 = vst [vmem:[%s1770_s14 + $0x18] sm:$0xff] %v1317_v25   ;;  %1345 = vst [vmem:[%s1770_s14 + $0x38] sm:$0xff] %v1337_v26  }
 0x236 PF: > { %s15_s24 = sadd.s32 1, %s1641_s24   ;;  %s1904_s18 = smov %s1621_s19 }
 0x237   : > { %p12_p0 = scmp.ge.s32.totalorder %s15_s24, 6   ;;  %s1905_s19 = smov %s1725_s6 }
 0x238   : > { %s1906_s20 = smov %s1633_s22  ;;  %s1907_s21 = smov %s1637_s23 }
 0x239   : > { %s1908_s22 = smov %s1911_s25  ;;  %s1909_s23 = smov %s1915_s26 }
 0x23a   :  { %14 = sbr.rel (!%p12_p0) target bundleno = 4 (0x4), region = 130 }

// kernel: sagenet_forward.5
= control target key start
LH: loop header
LB: loop body
LE: loop exit
PB: predicated region body
PF: predicated region fallthrough
CT: control target
= control target key end

     0   :  { %s2190_s0 = inlined_call_operand.vmem [shape: bf16[256,256], index: 0, kind: input, shape index: {}]   ;;  %s2191_s1 = inlined_call_operand.vmem [shape: bf16[256,128], index: 1, kind: input, shape index: {}, may-alias: {1,2}]   ;;  %s2192_s2 = inlined_call_operand.vmem [shape: bf16[256,128], index: 2, kind: input, shape index: {}, may-alias: {1,2}]   ;;  %s2193_s3 = inlined_call_operand.vmem [shape: bf16[8,256], index: 3, kind: input, shape index: {}]   ;;  %s2194_s4 = inlined_call_operand.vmem [shape: bf16[256,128], index: 4, kind: input, shape index: {}]   ;;  %s2195_s5 = inlined_call_operand.vmem [shape: f32[1,128], index: 5, kind: input, shape index: {}]   ;;  %s2196_s6 = inlined_call_operand.vmem [shape: f32[128,128], index: 6, kind: input, shape index: {}]   ;;  %s2197_s7 = inlined_call_operand.vmem [shape: f32[1,128], index: 7, kind: input, shape index: {}]   ;;  %s2198_s8 = inlined_call_operand.hbm [shape: f32[8,128], index: 8, kind: output, shape index: {}]  }
   0x1   :  { %2201 = sst [smem:[#allocation10_spill]] %s2190_s0 }
   0x2   :  { %13 = vsyncpa [#allocation6], 0  ;;  %s1869_s27 = smov 0   ;;  %s1871_s28 = smov 0  }
   0x3   :  { %s1873_s29 = smov 0   ;;  %s1875_s30 = smov 0  }
   0x4   :  { %s1877_s9 = smov 0   ;;  %s1879_s10 = smov 0  }
   0x5   :  { %s1881_s11 = smov 0  }
   0x6 LB: > { %s28_s13 = sadd.s32 1, %s1807_s9  ;;  %s31_s14 = sadd.s32 1, %s1811_s10  ;;  %s1815_s11 = sphi %s1881_s11, %s19_s11   ;;  %s1811_s10 = sphi %s1879_s10, %s2214_s10   ;;  %s1807_s9 = sphi %s1877_s9, %s2213_s9   ;;  %s1803_s30 = sphi %s1875_s30, %s2212_s30   ;;  %s1799_s29 = sphi %s1873_s29, %s2211_s29   ;;  %s1795_s28 = sphi %s1871_s28, %s2210_s28   ;;  %s1791_s27 = sphi %s1869_s27, %s2209_s27  }
   0x7   : > { %p29_p0 = scmp.ge.s32.totalorder %s28_s13, 2  ;;  %p47_p1 = scmp.ne.s32.totalorder %s1795_s28, %s1791_s27 }
   0x8   : > { %p48_p2 = scmp.eq.s32.totalorder %s1815_s11, 0  ;;  %s40_s18 = sadd.s32 1, %s1795_s28 }
   0x9   : > { %s2216_s13 = smov (%p29_p0, %s28_s13), 0  ;;  %s2218_s14 = smov (!%p29_p0, %s31_s14), %s1811_s10 }
   0xa   : > { %2202 = sst [smem:[#allocation8_spill]] %s2216_s13  ;;  %p33_p3 = scmp.ge.s32.totalorder %s2218_s14, 2 }
   0xb   : > { %s36_s15 = ssub.s32 %s1807_s9, %s2216_s13  ;;  %p49_p4 = por %p48_p2, %p47_p1 }
   0xc   : > { %s2220_s14 = smov (%p33_p3, %s2218_s14), 0  ;;  %p1354_p6 = scmp.ge.s32.totalorder %s1815_s11, 4 }
   0xd   : > { %2203 = sst [smem:[#allocation9_spill]] %s2220_s14  ;;  %s35_s16 = ssub.s32 %s1811_s10, %s2220_s14 }
   0xe   : > { %s37_s17 = sor.u32 %s36_s15, %s35_s16  ;;  %268 = sbr.rel (%p1354_p6) target bundleno = 39 (0x27), region = 32 }
   0xf   : > { %p38_p5 = scmp.eq.s32.totalorder %s37_s17, 0 }
  0x11   : > { %s1921_s19 = scalar_select %p38_p5, %s1795_s28, %s40_s18  }
  0x13   : > { %271 = sbr.rel (!%p49_p4) target bundleno = 39 (0x27), region = 36  ;;  %s273_s20 = sand.u32 (%p49_p4), 1, %s1795_s28  }
  0x14   : > { %s1414_s21 = sshll.u32 (%p49_p4), %s1811_s10, 5  ;;  %s1355_s22 = sshll.u32 (%p49_p4), %s273_s20, 6 }
  0x15   : > { %s278_s23 = sadd.s32 (%p49_p4), %s1807_s9, %s1414_s21  ;;  %s2204_s0 = sld [smem:[#allocation10_spill]] (%p49_p4) }
  0x16   : > { %s1358_s24 = sshll.u32 (%p49_p4), %s278_s23, 2  ;;  %s275_s16 = scalar_lea.vmem (%p49_p4), [#allocation4], %s1355_s22 }
  0x1b   : > { %s1930_s15 = scalar_lea.vmem %s2204_s0, %s1358_s24 }
  0x1c   : > { %v297_v0 = vld [vmem:[%s1930_s15] sm:$0xf]  ;;  %v299_v1 = vld [vmem:[%s1930_s15 + $0x8] sm:$0xf]  ;;  %v301_v2 = vld [vmem:[%s1930_s15 + $0x10] sm:$0xf] }
  0x1d   : > { %298 = vst [vmem:[%s275_s16] sm:$0xf] %v297_v0  ;;  %300 = vst [vmem:[%s275_s16 + $0x4] sm:$0xf] %v299_v1  ;;  %v303_v3 = vld [vmem:[%s1930_s15 + $0x18] sm:$0xf] }
  0x1e   : > { %302 = vst [vmem:[%s275_s16 + $0x8] sm:$0xf] %v301_v2  ;;  %v305_v4 = vld [vmem:[%s1930_s15 + $0x20] sm:$0xf]  ;;  %v307_v5 = vld [vmem:[%s1930_s15 + $0x28] sm:$0xf] }
  0x1f   : > { %304 = vst [vmem:[%s275_s16 + $0xc] sm:$0xf] %v303_v3  ;;  %306 = vst [vmem:[%s275_s16 + $0x10] sm:$0xf] %v305_v4  ;;  %v309_v6 = vld [vmem:[%s1930_s15 + $0x30] sm:$0xf] }
  0x20   : > { %308 = vst [vmem:[%s275_s16 + $0x14] sm:$0xf] %v307_v5  ;;  %v311_v7 = vld [vmem:[%s1930_s15 + $0x38] sm:$0xf]  ;;  %v313_v8 = vld [vmem:[%s1930_s15 + $0x40] sm:$0xf] }
  0x21   : > { %310 = vst [vmem:[%s275_s16 + $0x18] sm:$0xf] %v309_v6  ;;  %312 = vst [vmem:[%s275_s16 + $0x1c] sm:$0xf] %v311_v7  ;;  %v315_v9 = vld [vmem:[%s1930_s15 + $0x48] sm:$0xf] }
  0x22   : > { %314 = vst [vmem:[%s275_s16 + $0x20] sm:$0xf] %v313_v8  ;;  %v317_v10 = vld [vmem:[%s1930_s15 + $0x50] sm:$0xf]  ;;  %v319_v11 = vld [vmem:[%s1930_s15 + $0x58] sm:$0xf] }
  0x23   : > { %316 = vst [vmem:[%s275_s16 + $0x24] sm:$0xf] %v315_v9  ;;  %318 = vst [vmem:[%s275_s16 + $0x28] sm:$0xf] %v317_v10  ;;  %v321_v12 = vld [vmem:[%s1930_s15 + $0x60] sm:$0xf] }
  0x24   : > { %320 = vst [vmem:[%s275_s16 + $0x2c] sm:$0xf] %v319_v11  ;;  %v323_v13 = vld [vmem:[%s1930_s15 + $0x68] sm:$0xf]  ;;  %v325_v14 = vld [vmem:[%s1930_s15 + $0x70] sm:$0xf] }
  0x25   : > { %322 = vst [vmem:[%s275_s16 + $0x30] sm:$0xf] %v321_v12  ;;  %324 = vst [vmem:[%s275_s16 + $0x34] sm:$0xf] %v323_v13  ;;  %v327_v15 = vld [vmem:[%s1930_s15 + $0x78] sm:$0xf] }
  0x26   : > { %326 = vst [vmem:[%s275_s16 + $0x38] sm:$0xf] %v325_v14  ;;  %328 = vst [vmem:[%s275_s16 + $0x3c] sm:$0xf] %v327_v15 }
  0x27 PF: > { %p1359_p7 = scmp.ge.s32.totalorder %s1815_s11, 1  ;;  %p408_p8 = scmp.lt.s32.totalorder %s1815_s11, 5 }
  0x29   : > { %p409_p9 = pnand %p1359_p7, %p408_p8 }
  0x2a   : > { %s415_s17 = sand.u32 (!%p409_p9), 1, %s1791_s27   ;;  %s1361_s18 = sshll.u32 (!%p409_p9), %s1799_s29, 4 }
  0x2b   : > { %412 = sbr.rel (%p409_p9) target bundleno = 1095 (0x447), region = 89  ;;  %s1360_s20 = sshll.u32 (!%p409_p9), %s415_s17, 6 }
  0x2c   : > { %p459_p10 = scmp.lt.s32.totalorder (!%p409_p9), %s1361_s18, 31  ;;  %s1363_s21 = sshll.u32 (!%p409_p9), %s1803_s30, 4 }
  0x2d   : > { %p465_p11 = scmp.lt.s32.totalorder (!%p409_p9), %s1363_s21, 31  ;;  %p470_p12 = scmp.lt.s32.totalorder (!%p409_p9), %s1803_s30, 1 }
  0x2e   : > { %p475_p13 = scmp.eq.s32.totalorder (!%p409_p9), %s1803_s30, 0  ;;  %p476_p0 = scmp.eq.s32.totalorder (!%p409_p9), %s1799_s29, 0 }
  0x2f   : > { %s1972_s13 = scalar_lea.vmem (!%p409_p9), [#allocation4], %s1360_s20 }
  0x30   : > { %s2222_s18 = smov (!%p459_p10, %s1361_s18), 31  ;;  %s2224_s21 = smov (!%p465_p11, %s1363_s21), 31 }
  0x31   : > { %s1362_s22 = sshll.u32 %s2222_s18, 2  ;;  %s1364_s15 = sshll.u32 %s2224_s21, 2 }
  0x32   : > { %s1958_s25 = scalar_lea.vmem %s2191_s1, %s1362_s22  ;;  %p477_p1 = pnand %p476_p0, %p475_p13 }
  0x33   : > { %s471_s26 = scalar_select %p470_p12, %s1803_s30, 1 }
  0x34   : > { %s1965_s17 = scalar_lea.vmem %s2192_s2, %s1364_s15  ;;  %480 = sbr.rel (%p477_p1) target bundleno = 59 (0x3b), region = 97 }
  0x35   : > { %s1365_s12 = sshll.u32 %s471_s26, 2 }
  0x36   : > { %s1970_s18 = scalar_lea.vmem %s2193_s3, %s1365_s12 }
  0x39   : > { %v1817_v16 = vmov 0.0  }
  0x3a   : > { %481 = vst [vmem:[#allocation3] sm:$0xff] %v1817_v16 }
  0x3b PF: > { %p1366_p2 = scmp.ne.s32.totalorder %s1799_s29, 0 }
  0x3d   : > { %484 = sbr.rel (%p1366_p2) target bundleno = 75 (0x4b), region = 101 }
  0x42   : > { %v1818_v17 = vmov 0.0  }
  0x43   : > { %485 = vst [vmem:[#allocation2 + $0x30] sm:$0xff] %v1818_v17  ;;  %486 = vst [vmem:[#allocation2] sm:$0xff] %v1818_v17 }
  0x44   : > { %487 = vst [vmem:[#allocation2 + $0x58] sm:$0xff] %v1818_v17  ;;  %488 = vst [vmem:[#allocation2 + $0x18] sm:$0xff] %v1818_v17 }
  0x45   : > { %489 = vst [vmem:[#allocation2 + $0x50] sm:$0xff] %v1818_v17  ;;  %490 = vst [vmem:[#allocation2 + $0x68] sm:$0xff] %v1818_v17 }
  0x46   : > { %491 = vst [vmem:[#allocation2 + $0x8] sm:$0xff] %v1818_v17  ;;  %492 = vst [vmem:[#allocation2 + $0x48] sm:$0xff] %v1818_v17 }
  0x47   : > { %493 = vst [vmem:[#allocation2 + $0x40] sm:$0xff] %v1818_v17  ;;  %494 = vst [vmem:[#allocation2 + $0x20] sm:$0xff] %v1818_v17 }
  0x48   : > { %495 = vst [vmem:[#allocation2 + $0x10] sm:$0xff] %v1818_v17  ;;  %496 = vst [vmem:[#allocation2 + $0x38] sm:$0xff] %v1818_v17 }
  0x49   : > { %497 = vst [vmem:[#allocation2 + $0x60] sm:$0xff] %v1818_v17  ;;  %498 = vst [vmem:[#allocation2 + $0x70] sm:$0xff] %v1818_v17 }
  0x4a   : > { %499 = vst [vmem:[#allocation2 + $0x78] sm:$0xff] %v1818_v17  ;;  %500 = vst [vmem:[#allocation2 + $0x28] sm:$0xff] %v1818_v17 }
  0x4b PF: > { %v1693_v18 = vld [vmem:[%s1958_s25 + $0x38] sm:$0xff]   ;;  %v1694_v19 = vld [vmem:[%s1958_s25 + $0x30] sm:$0xff]   ;;  %v1695_v20 = vld [vmem:[%s1958_s25 + $0x28] sm:$0xff]   ;;  %p774_p3 = scmp.eq.s32.totalorder %s1799_s29, 1  ;;  %p1383_p4 = scmp.ne.s32.totalorder %s1799_s29, 1 }
  0x4c   : > { %1521 = vmatprep.subr.bf16.mxu0 %v1693_v18  ;;  %1608 = vmatprep.subr.bf16.mxu1 %v1693_v18  ;;  %v1696_v21 = vld [vmem:[%s1958_s25 + $0x20] sm:$0xff]   ;;  %v1701_v22 = vld [vmem:[%s1972_s13] sm:$0xff]   ;;  %v1697_v24 = vld [vmem:[%s1958_s25 + $0x18] sm:$0xff]  }
  0x4d   : > { %1522 = vmatpush3.bf16.msra.mxu0 %v1693_v18  ;;  %1616 = vmatpush3.bf16.msra.mxu1 %v1693_v18  ;;  %v1702_v23 = vld [vmem:[%s1972_s13 + $0x20] sm:$0xff]   ;;  %v1698_v25 = vld [vmem:[%s1958_s25 + $0x10] sm:$0xff]   ;;  %v1700_v27 = vld [vmem:[%s1958_s25] sm:$0xff]  }
  0x4e   : > { %1523 = vmatprep.subr.bf16.mxu0 %v1694_v19  ;;  %1609 = vmatprep.subr.bf16.mxu1 %v1694_v19  ;;  %v1699_v26 = vld [vmem:[%s1958_s25 + $0x8] sm:$0xff]   ;;  %v1703_v28 = vld [vmem:[%s1972_s13 + $0x8] sm:$0xff]   ;;  %v1705_v30 = vld [vmem:[%s1972_s13 + $0x10] sm:$0xff]  }
  0x4f   : > { %1537 = vmatprep.mubr.bf16.mxu0 %v1701_v22  ;;  %1545 = vmatprep.mubr.bf16.mxu1 %v1702_v23  ;;  %v1704_v29 = vld [vmem:[%s1972_s13 + $0x28] sm:$0xff]   ;;  %v1706_v31 = vld [vmem:[%s1972_s13 + $0x30] sm:$0xff]   ;;  %v1707_v32 = vld [vmem:[%s1972_s13 + $0x18] sm:$0xff]  }
  0x50   : > { %v1708_v33 = vld [vmem:[%s1972_s13 + $0x38] sm:$0xff]   ;;  %v503_v34 = vld [vmem:[#allocation2 + $0x58] sm:$0xff]  ;;  %v511_v35 = vld [vmem:[#allocation2 + $0x10] sm:$0xff] }
  0x51   : > { %1524 = vmatpush3.bf16.msra.mxu0 %v1694_v19  ;;  %1617 = vmatpush3.bf16.msra.mxu1 %v1694_v19  ;;  %v501_v38 = vld [vmem:[#allocation2 + $0x30] sm:$0xff]  ;;  %v509_v39 = vld [vmem:[#allocation2 + $0x40] sm:$0xff]  ;;  %v504_v44 = vld [vmem:[#allocation2 + $0x18] sm:$0xff] }
  0x52   : > { %1525 = vmatprep.subr.bf16.mxu0 %v1695_v20  ;;  %1610 = vmatprep.subr.bf16.mxu1 %v1695_v20  ;;  %v512_v45 = vld [vmem:[#allocation2 + $0x38] sm:$0xff]  ;;  %v502_v50 = vld [vmem:[#allocation2] sm:$0xff]  ;;  %v507_v56 = vld [vmem:[#allocation2 + $0x8] sm:$0xff] }
  0x53   : > { %v510_v51 = vld [vmem:[#allocation2 + $0x20] sm:$0xff]  ;;  %v515_v57 = vld [vmem:[#allocation2 + $0x78] sm:$0xff]  ;;  %v505_v62 = vld [vmem:[#allocation2 + $0x50] sm:$0xff] }
  0x54   : > { %v513_v63 = vld [vmem:[#allocation2 + $0x60] sm:$0xff]  ;;  %v508_v4 = vld [vmem:[#allocation2 + $0x48] sm:$0xff]  ;;  %v514_v11 = vld [vmem:[#allocation2 + $0x70] sm:$0xff] }
  0x55   : > { %1526 = vmatpush3.bf16.msra.mxu0 %v1695_v20  ;;  %1618 = vmatpush3.bf16.msra.mxu1 %v1695_v20  ;;  %v516_v5 = vld [vmem:[#allocation2 + $0x28] sm:$0xff] }
  0x56   : > { %1527 = vmatprep.subr.bf16.mxu0 %v1696_v21  ;;  %1611 = vmatprep.subr.bf16.mxu1 %v1696_v21  ;;  %v506_v10 = vld [vmem:[#allocation2 + $0x68] sm:$0xff] }
  0x59   : > { %1528 = vmatpush3.bf16.msra.mxu0 %v1696_v21  ;;  %1619 = vmatpush3.bf16.msra.mxu1 %v1696_v21 }
  0x5a   : > { %1529 = vmatprep.subr.bf16.mxu0 %v1697_v24  ;;  %1612 = vmatprep.subr.bf16.mxu1 %v1697_v24 }
  0x5d   : > { %1530 = vmatpush3.bf16.msra.mxu0 %v1697_v24  ;;  %1620 = vmatpush3.bf16.msra.mxu1 %v1697_v24 }
  0x5e   : > { %1531 = vmatprep.subr.bf16.mxu0 %v1698_v25  ;;  %1613 = vmatprep.subr.bf16.mxu1 %v1698_v25 }
  0x61   : > { %1532 = vmatpush3.bf16.msra.mxu0 %v1698_v25  ;;  %1621 = vmatpush3.bf16.msra.mxu1 %v1698_v25 }
  0x62   : > { %1533 = vmatprep.subr.bf16.mxu0 %v1699_v26  ;;  %1614 = vmatprep.subr.bf16.mxu1 %v1699_v26 }
  0x65   : > { %1534 = vmatpush3.bf16.msra.mxu0 %v1699_v26  ;;  %1622 = vmatpush3.bf16.msra.mxu1 %v1699_v26 }
  0x66   : > { %1535 = vmatprep.subr.bf16.mxu0 %v1700_v27  ;;  %1615 = vmatprep.subr.bf16.mxu1 %v1700_v27 }
  0x69   : > { %1536 = vmatpush3.bf16.msra.mxu0 %v1700_v27  ;;  %1623 = vmatpush3.bf16.msra.mxu1 %v1700_v27 }
  0x6c   : > { %1538 = vmatmul.mubr.bf16.vlgmr.msra.gmra.mxu0 %v1703_v28  ;;  %1546 = vmatmul.mubr.bf16.vlgmr.msra.gmra.mxu1 %v1704_v29 }
  0x6d   : > { %1541 = vmatprep.mubr.bf16.mxu0 %v1705_v30  ;;  %1549 = vmatprep.mubr.bf16.mxu1 %v1706_v31 }
  0x74   : > { %1542 = vmatmul.mubr.bf16.gmra.mxu0 %v1707_v32  ;;  %1550 = vmatmul.mubr.bf16.gmra.mxu1 %v1708_v33 }
 0x12c   : > { %v1539_v36 = vpop.f32.mrf.mxu0  ;;  %v1547_v37 = vpop.f32.mrf.mxu1 }
 0x12d   : > { %v744_v40 = vadd.f32 %v1539_v36, %v503_v34  ;;  %v752_v41 = vadd.f32 %v1547_v37, %v511_v35 }
 0x12e   : > { %v679_v42 = vpop.f32.mrf.mxu0  ;;  %v711_v43 = vpop.f32.mrf.mxu1 }
 0x12f   : > { %760 = vst [vmem:[#allocation2 + $0x58] sm:$0xff] %v744_v40  ;;  %768 = vst [vmem:[#allocation2 + $0x10] sm:$0xff] %v752_v41  ;;  %v742_v46 = vadd.f32 %v679_v42, %v501_v38  ;;  %v750_v47 = vadd.f32 %v711_v43, %v509_v39 }
 0x130   : > { %v1540_v48 = vpop.f32.mrf.mxu0  ;;  %v1548_v49 = vpop.f32.mrf.mxu1 }
 0x131   : > { %758 = vst [vmem:[#allocation2 + $0x30] sm:$0xff] %v742_v46  ;;  %766 = vst [vmem:[#allocation2 + $0x40] sm:$0xff] %v750_v47  ;;  %v745_v52 = vadd.f32 %v1540_v48, %v504_v44  ;;  %v753_v53 = vadd.f32 %v1548_v49, %v512_v45 }
 0x132   : > { %v682_v54 = vpop.f32.mrf.mxu0  ;;  %v714_v55 = vpop.f32.mrf.mxu1 }
 0x133   : > { %761 = vst [vmem:[#allocation2 + $0x18] sm:$0xff] %v745_v52  ;;  %769 = vst [vmem:[#allocation2 + $0x38] sm:$0xff] %v753_v53  ;;  %v743_v58 = vadd.f32 %v682_v54, %v502_v50  ;;  %v751_v59 = vadd.f32 %v714_v55, %v510_v51 }
 0x134   : > { %v1543_v60 = vpop.f32.mrf.mxu0  ;;  %v1551_v61 = vpop.f32.mrf.mxu1 }
 0x135   : > { %759 = vst [vmem:[#allocation2] sm:$0xff] %v743_v58  ;;  %767 = vst [vmem:[#allocation2 + $0x20] sm:$0xff] %v751_v59  ;;  %v748_v0 = vadd.f32 %v1543_v60, %v507_v56  ;;  %v756_v1 = vadd.f32 %v1551_v61, %v515_v57 }
 0x136   : > { %v695_v2 = vpop.f32.mrf.mxu0  ;;  %v727_v3 = vpop.f32.mrf.mxu1 }
 0x137   : > { %764 = vst [vmem:[#allocation2 + $0x8] sm:$0xff] %v748_v0  ;;  %772 = vst [vmem:[#allocation2 + $0x78] sm:$0xff] %v756_v1  ;;  %v746_v6 = vadd.f32 %v695_v2, %v505_v62  ;;  %v754_v7 = vadd.f32 %v727_v3, %v513_v63 }
 0x138   : > { %v1544_v8 = vpop.f32.mrf.mxu0  ;;  %v1552_v9 = vpop.f32.mrf.mxu1 }
 0x139   : > { %762 = vst [vmem:[#allocation2 + $0x50] sm:$0xff] %v746_v6  ;;  %770 = vst [vmem:[#allocation2 + $0x60] sm:$0xff] %v754_v7  ;;  %v749_v12 = vadd.f32 %v1544_v8, %v508_v4  ;;  %v757_v13 = vadd.f32 %v1552_v9, %v516_v5  ;;  %777 = sbr.rel (%p1383_p4) target bundleno = 842 (0x34a), region = 105 }
 0x13a   : > { %v698_v14 = vpop.f32.mrf.mxu0  ;;  %v730_v15 = vpop.f32.mrf.mxu1 }
 0x13b   : > { %765 = vst [vmem:[#allocation2 + $0x48] sm:$0xff] %v749_v12  ;;  %773 = vst [vmem:[#allocation2 + $0x28] sm:$0xff] %v757_v13  ;;  %v747_v16 = vadd.f32 %v698_v14, %v506_v10  ;;  %v755_v17 = vadd.f32 %v730_v15, %v514_v11 }
 0x13d   : > { %763 = vst [vmem:[#allocation2 + $0x68] sm:$0xff] %v747_v16  ;;  %771 = vst [vmem:[#allocation2 + $0x70] sm:$0xff] %v755_v17 }
 0x13e   : > { %v1709_v18 = vld [vmem:[%s2194_s4 + $0x78] sm:$0xff]   ;;  %v1711_v20 = vld [vmem:[%s2194_s4 + $0x70] sm:$0xff]   ;;  %v1713_v22 = vld [vmem:[%s2194_s4 + $0x68] sm:$0xff]   ;;  %v1819_v2 = vmov 0.0   ;;  %vm1820_vm0 = vmmov 0  }
 0x13f   : > { %v1710_v19 = vld [vmem:[%s2194_s4 + $0x38] sm:$0xff]   ;;  %1431 = vmatprep.subr.bf16.mxu0 %v1709_v18  ;;  %v1712_v21 = vld [vmem:[%s2194_s4 + $0x30] sm:$0xff]   ;;  %v1714_v23 = vld [vmem:[%s2194_s4 + $0x28] sm:$0xff]   ;;  %1553 = vmatprep.subr.bf16.mxu1 %v1819_v2 }
 0x140   : > { %1432 = vmatpush3.bf16.msra.mxu0 %v1710_v19  ;;  %v1715_v24 = vld [vmem:[%s2194_s4 + $0x60] sm:$0xff]   ;;  %v1717_v26 = vld [vmem:[%s2194_s4 + $0x58] sm:$0xff]   ;;  %v1719_v28 = vld [vmem:[%s2194_s4 + $0x50] sm:$0xff]   ;;  %1569 = vmatprep.mubr.msk.bf16.mxu1 %vm1820_vm0, %v1819_v2 }
 0x141   : > { %1433 = vmatprep.subr.bf16.mxu0 %v1711_v20  ;;  %v1716_v25 = vld [vmem:[%s2194_s4 + $0x20] sm:$0xff]   ;;  %v1718_v27 = vld [vmem:[%s2194_s4 + $0x18] sm:$0xff]   ;;  %v1720_v30 = vld [vmem:[%s2194_s4 + $0x10] sm:$0xff]  }
 0x142   : > { %v1725_v29 = vld [vmem:[%s1965_s17] sm:$0xff]   ;;  %v1721_v31 = vld [vmem:[%s2194_s4 + $0x48] sm:$0xff]   ;;  %v778_v35 = vld [vmem:[#allocation2 + $0x30] sm:$0xff] }
 0x143   : > { %1033 = vmatprep.mubr.bf16.mxu0 %v1725_v29  ;;  %v1722_v32 = vld [vmem:[%s2194_s4 + $0x8] sm:$0xff]   ;;  %v1723_v33 = vld [vmem:[%s2194_s4 + $0x40] sm:$0xff]   ;;  %v780_v39 = vld [vmem:[#allocation2 + $0x58] sm:$0xff] }
 0x144   : > { %1434 = vmatpush3.bf16.msra.mxu0 %v1712_v21  ;;  %v1724_v34 = vld [vmem:[%s2194_s4] sm:$0xff]   ;;  %v1726_v38 = vld [vmem:[%s1965_s17 + $0x8] sm:$0xff]   ;;  %v781_v40 = vld [vmem:[#allocation2 + $0x18] sm:$0xff] }
 0x145   : > { %1435 = vmatprep.subr.bf16.mxu0 %v1713_v22  ;;  %v779_v36 = vld [vmem:[#allocation2] sm:$0xff]  ;;  %v795_v41 = vpack.c.bf16 %v781_v40, %v780_v39  ;;  %v1727_v42 = vld [vmem:[%s1965_s17 + $0x10] sm:$0xff]   ;;  %v783_v44 = vld [vmem:[#allocation2 + $0x68] sm:$0xff] }
 0x146   : > { %v794_v37 = vpack.c.bf16 %v779_v36, %v778_v35  ;;  %v782_v43 = vld [vmem:[#allocation2 + $0x50] sm:$0xff]  ;;  %v1728_v46 = vld [vmem:[%s1965_s17 + $0x18] sm:$0xff]   ;;  %v784_v47 = vld [vmem:[#allocation2 + $0x8] sm:$0xff] }
 0x147   : > { %v796_v45 = vpack.c.bf16 %v783_v44, %v782_v43  ;;  %v785_v48 = vld [vmem:[#allocation2 + $0x48] sm:$0xff]  ;;  %v1729_v50 = vld [vmem:[%s1965_s17 + $0x20] sm:$0xff]   ;;  %v788_v55 = vld [vmem:[#allocation2 + $0x10] sm:$0xff] }
 0x148   : > { %1436 = vmatpush3.bf16.msra.mxu0 %v1714_v23  ;;  %v797_v49 = vpack.c.bf16 %v785_v48, %v784_v47  ;;  %v786_v51 = vld [vmem:[#allocation2 + $0x40] sm:$0xff]  ;;  %v1730_v54 = vld [vmem:[%s1965_s17 + $0x28] sm:$0xff]   ;;  %v789_v56 = vld [vmem:[#allocation2 + $0x38] sm:$0xff] }
 0x149   : > { %1437 = vmatprep.subr.bf16.mxu0 %v1715_v24  ;;  %v787_v52 = vld [vmem:[#allocation2 + $0x20] sm:$0xff]  ;;  %v799_v57 = vpack.c.bf16 %v789_v56, %v788_v55  ;;  %v1731_v58 = vld [vmem:[%s1965_s17 + $0x30] sm:$0xff]   ;;  %v1732_v62 = vld [vmem:[%s1965_s17 + $0x38] sm:$0xff]  }
 0x14a   : > { %v798_v53 = vpack.c.bf16 %v787_v52, %v786_v51  ;;  %v790_v59 = vld [vmem:[#allocation2 + $0x60] sm:$0xff]  ;;  %v791_v60 = vld [vmem:[#allocation2 + $0x70] sm:$0xff]  ;;  %v792_v63 = vld [vmem:[#allocation2 + $0x78] sm:$0xff] }
 0x14b   : > { %v800_v61 = vpack.c.bf16 %v791_v60, %v790_v59  ;;  %v793_v0 = vld [vmem:[#allocation2 + $0x28] sm:$0xff]  ;;  %v2054_v7 = vld [vmem:[%s2195_s5] ss:$0 sm:$0xff] }
 0x14c   : > { %1438 = vmatpush3.bf16.msra.mxu0 %v1716_v25  ;;  %v801_v1 = vpack.c.bf16 %v793_v0, %v792_v63 }
 0x14d   : > { %1439 = vmatprep.subr.bf16.mxu0 %v1717_v26 }
 0x150   : > { %1440 = vmatpush3.bf16.msra.mxu0 %v1718_v27 }
 0x151   : > { %1441 = vmatprep.subr.bf16.mxu0 %v1719_v28 }
 0x154   : > { %1442 = vmatpush3.bf16.msra.mxu0 %v1720_v30 }
 0x155   : > { %1443 = vmatprep.subr.bf16.mxu0 %v1721_v31 }
 0x158   : > { %1444 = vmatpush3.bf16.msra.mxu0 %v1722_v32 }
 0x159   : > { %1445 = vmatprep.subr.bf16.mxu0 %v1723_v33 }
 0x15c   : > { %1446 = vmatpush3.bf16.msra.mxu0 %v1724_v34 }
 0x15f   : > { %1034 = vmatmul.mubr.bf16.vlgmr.msra.gmra.mxu0 %v794_v37 }
 0x160   : > { %1041 = vmatprep.mubr.bf16.mxu0 %v1726_v38 }
 0x167   : > { %1042 = vmatmul.mubr.bf16.gmra.mxu0 %v795_v41 }
 0x168   : > { %1049 = vmatprep.mubr.bf16.mxu0 %v1727_v42 }
 0x16f   : > { %1050 = vmatmul.mubr.bf16.gmra.mxu0 %v796_v45 }
 0x170   : > { %1057 = vmatprep.mubr.bf16.mxu0 %v1728_v46 }
 0x177   : > { %1058 = vmatmul.mubr.bf16.gmra.mxu0 %v797_v49 }
 0x178   : > { %1065 = vmatprep.mubr.bf16.mxu0 %v1729_v50 }
 0x17f   : > { %1066 = vmatmul.mubr.bf16.gmra.mxu0 %v798_v53 }
 0x180   : > { %1073 = vmatprep.mubr.bf16.mxu0 %v1730_v54 }
 0x187   : > { %1074 = vmatmul.mubr.bf16.gmra.mxu0 %v799_v57 }
 0x188   : > { %1081 = vmatprep.mubr.bf16.mxu0 %v1731_v58 }
 0x18f   : > { %1082 = vmatmul.mubr.bf16.gmra.mxu0 %v800_v61 }
 0x190   : > { %1089 = vmatprep.mubr.bf16.mxu0 %v1732_v62 }
 0x197   : > { %1090 = vmatmul.mubr.bf16.gmra.mxu0 %v801_v1 }
 0x21f   : > { %v1447_v3 = vpop.f32.mrf.mxu0 }
 0x221   : > { %v1448_v4 = vpop.f32.mrf.mxu0 }
 0x222   : > { %v1449_v5 = vadd.f32 %v1448_v4, %v1447_v3 }
 0x223   : > { %v1450_v6 = vpop.f32.mrf.mxu0 }
 0x224   : > { %v2057_v11 = vadd.f32 %v1449_v5, %v2054_v7 }
 0x225   : > { %v1451_v8 = vpop.f32.mrf.mxu0 }
 0x226   : > { %v1452_v9 = vadd.f32 %v1451_v8, %v1450_v6 }
 0x227   : > { %v1453_v10 = vpop.f32.mrf.mxu0 }
 0x228   : > { %v2060_v12 = vadd.f32 %v1452_v9, %v2054_v7 }
 0x229   : > { %v1454_v13 = vpop.f32.mrf.mxu0 }
 0x22a   : > { %v1455_v14 = vadd.f32 %v1454_v13, %v1453_v10  ;;  %v1100_v15 = vpack.c.bf16 %v2060_v12, %v2057_v11 }
 0x22b   : > { %v1456_v16 = vpop.f32.mrf.mxu0 }
 0x22c   : > { %v2065_v20 = vadd.f32 %v1455_v14, %v2054_v7 }
 0x22d   : > { %v1457_v17 = vpop.f32.mrf.mxu0 }
 0x22e   : > { %v1458_v18 = vadd.f32 %v1457_v17, %v1456_v16  ;;  %v1099_v17 = vld [vmem:[%s1970_s18] sm:$0xf] }
 0x22f   : > { %v1459_v19 = vpop.f32.mrf.mxu0 }
 0x230   : > { %v2068_v21 = vadd.f32 %v1458_v18, %v2054_v7 }
 0x231   : > { %v1460_v22 = vpop.f32.mrf.mxu0 }
 0x232   : > { %v1461_v23 = vadd.f32 %v1460_v22, %v1459_v19  ;;  %v1101_v24 = vpack.c.bf16 %v2068_v21, %v2065_v20 }
 0x233   : > { %v1462_v25 = vpop.f32.mrf.mxu0 }
 0x234   : > { %v1052_v14 = vadd.f32 %v1461_v23, %v2054_v7 }
 0x235   : > { %v1463_v26 = vpop.f32.mrf.mxu0 }
 0x236   : > { %v1464_v5 = vadd.f32 %v1463_v26, %v1462_v25 }
 0x237   : > { %v1465_v27 = vpop.f32.mrf.mxu0 }
 0x238   : > { %v1055_v10 = vadd.f32 %v1464_v5, %v2054_v7 }
 0x239   : > { %v1466_v28 = vpop.f32.mrf.mxu0 }
 0x23a   : > { %v1467_v3 = vadd.f32 %v1466_v28, %v1465_v27  ;;  %v1102_v16 = vpack.c.bf16 %v1055_v10, %v1052_v14 }
 0x23b   : > { %v1468_v29 = vpop.f32.mrf.mxu0 }
 0x23c   : > { %v1060_v9 = vadd.f32 %v1467_v3, %v2054_v7 }
 0x23d   : > { %v1469_v30 = vpop.f32.mrf.mxu0 }
 0x23e   : > { %v1470_v63 = vadd.f32 %v1469_v30, %v1468_v29 }
 0x23f   : > { %v1471_v31 = vpop.f32.mrf.mxu0 }
 0x240   : > { %v1063_v6 = vadd.f32 %v1470_v63, %v2054_v7 }
 0x241   : > { %v1472_v32 = vpop.f32.mrf.mxu0 }
 0x242   : > { %v1473_v61 = vadd.f32 %v1472_v32, %v1471_v31  ;;  %v1103_v13 = vpack.c.bf16 %v1063_v6, %v1060_v9 }
 0x243   : > { %v1474_v33 = vpop.f32.mrf.mxu0 }
 0x244   : > { %v1068_v4 = vadd.f32 %v1473_v61, %v2054_v7 }
 0x245   : > { %v1475_v34 = vpop.f32.mrf.mxu0 }
 0x246   : > { %v1476_v58 = vadd.f32 %v1475_v34, %v1474_v33 }
 0x247   : > { %v1477_v35 = vpop.f32.mrf.mxu0 }
 0x248   : > { %v1071_v0 = vadd.f32 %v1476_v58, %v2054_v7 }
 0x249   : > { %v1478_v36 = vpop.f32.mrf.mxu0 }
 0x24a   : > { %v1479_v56 = vadd.f32 %v1478_v36, %v1477_v35  ;;  %v1104_v8 = vpack.c.bf16 %v1071_v0, %v1068_v4 }
 0x24b   : > { %v1480_v37 = vpop.f32.mrf.mxu0 }
 0x24c   : > { %v1076_v62 = vadd.f32 %v1479_v56, %v2054_v7 }
 0x24d   : > { %v1481_v38 = vpop.f32.mrf.mxu0 }
 0x24e   : > { %v1482_v53 = vadd.f32 %v1481_v38, %v1480_v37 }
 0x24f   : > { %v1483_v39 = vpop.f32.mrf.mxu0 }
 0x250   : > { %v1079_v59 = vadd.f32 %v1482_v53, %v2054_v7 }
 0x251   : > { %v1484_v40 = vpop.f32.mrf.mxu0 }
 0x252   : > { %v1485_v50 = vadd.f32 %v1484_v40, %v1483_v39  ;;  %v1105_v1 = vpack.c.bf16 %v1079_v59, %v1076_v62 }
 0x253   : > { %v1486_v41 = vpop.f32.mrf.mxu0 }
 0x254   : > { %v1084_v57 = vadd.f32 %v1485_v50, %v2054_v7 }
 0x255   : > { %v1487_v42 = vpop.f32.mrf.mxu0 }
 0x256   : > { %v1488_v48 = vadd.f32 %v1487_v42, %v1486_v41 }
 0x257   : > { %v1489_v43 = vpop.f32.mrf.mxu0 }
 0x258   : > { %v1087_v54 = vadd.f32 %v1488_v48, %v2054_v7 }
 0x259   : > { %v1490_v44 = vpop.f32.mrf.mxu0 }
 0x25a   : > { %v1491_v46 = vadd.f32 %v1490_v44, %v1489_v43  ;;  %v1106_v60 = vpack.c.bf16 %v1087_v54, %v1084_v57 }
 0x25b   : > { %v1492_v45 = vpop.f32.mrf.mxu0 }
 0x25c   : > { %v1092_v51 = vadd.f32 %v1491_v46, %v2054_v7 }
 0x25d   : > { %v1493_v47 = vpop.f32.mrf.mxu0 }
 0x25e   : > { %v1494_v49 = vadd.f32 %v1493_v47, %v1492_v45 }
 0x260   : > { %v1095_v52 = vadd.f32 %v1494_v49, %v2054_v7  ;;  %v1098_v7 = vld [vmem:[#allocation3] sm:$0xff] }
 0x262   : > { %v1107_v55 = vpack.c.bf16 %v1095_v52, %v1092_v51 }
 0x264   : > { %1554 = vmatpush3.bf16.msra.mxu1 %v1107_v55 }
 0x265   : > { %1555 = vmatprep.subr.bf16.mxu1 %v1819_v2 }
 0x268   : > { %1556 = vmatpush3.bf16.msra.mxu1 %v1106_v60 }
 0x269   : > { %1557 = vmatprep.subr.bf16.mxu1 %v1819_v2 }
 0x26c   : > { %1558 = vmatpush3.bf16.msra.mxu1 %v1105_v1 }
 0x26d   : > { %1559 = vmatprep.subr.bf16.mxu1 %v1819_v2 }
 0x270   : > { %1560 = vmatpush3.bf16.msra.mxu1 %v1104_v8 }
 0x271   : > { %1561 = vmatprep.subr.bf16.mxu1 %v1819_v2 }
 0x274   : > { %1562 = vmatpush3.bf16.msra.mxu1 %v1103_v13 }
 0x275   : > { %1563 = vmatprep.subr.bf16.mxu1 %v1819_v2 }
 0x278   : > { %1564 = vmatpush3.bf16.msra.mxu1 %v1102_v16 }
 0x279   : > { %1565 = vmatprep.subr.bf16.mxu1 %v1819_v2 }
 0x27c   : > { %1566 = vmatpush3.bf16.msra.mxu1 %v1101_v24 }
 0x27d   : > { %1567 = vmatprep.subr.bf16.mxu1 %v1819_v2 }
 0x280   : > { %1568 = vmatpush3.bf16.msra.mxu1 %v1100_v15 }
 0x283   : > { %1570 = vmatmul.mubr.bf16.vlgmr.msra.gmra.mxu1 %v1099_v17 }
 0x343   : > { %v1142_v18 = vpop.f32.mrf.mxu1 }
 0x344   : > { %v1148_v19 = vadd.f32 %v1142_v18, %v1098_v7 }
 0x345   : > { %v1571_v22 = vpop.f32.mrf.mxu1 }
 0x346   : > { %1149 = vst [vmem:[#allocation3] sm:$0xff] %v1148_v19 }
 0x347   : > { %v1145_v23 = vpop.f32.mrf.mxu1 }
 0x349   : > { %v1572_v25 = vpop.f32.mrf.mxu1 }
 0x34a PF: > { %p1150_p5 = scmp.eq.s32.totalorder %s1803_s30, 1 }
 0x34c   : > { %p1151_p6 = pnand %p1150_p5, %p774_p3 }
 0x34e   : > { %1154 = sbr.rel (%p1151_p6) target bundleno = 1080 (0x438), region = 109 }
 0x353   : > { %v1171_v2 = vld [vmem:[%s2196_s6 + $0x78] sm:$0xff]  ;;  %v1821_v11 = vmov 0.0   ;;  %v1170_v12 = vld [vmem:[%s2196_s6 + $0x70] sm:$0xff]  ;;  %vm1822_vm1 = vmmov 0   ;;  %v1169_v15 = vld [vmem:[%s2196_s6 + $0x68] sm:$0xff] }
 0x354   : > { %1573 = vmatprep.subr.mxu0 %v1821_v11  ;;  %1605 = vmatprep.mubr.msk.f32.mxu0 %vm1822_vm1, %v1821_v11  ;;  %v1168_v20 = vld [vmem:[%s2196_s6 + $0x60] sm:$0xff]  ;;  %v1167_v21 = vld [vmem:[%s2196_s6 + $0x58] sm:$0xff]  ;;  %v1166_v24 = vld [vmem:[%s2196_s6 + $0x50] sm:$0xff] }
 0x355   : > { %1574 = vmatpush3.msra.mxu0 %v1171_v2  ;;  %v1165_v26 = vld [vmem:[%s2196_s6 + $0x48] sm:$0xff]  ;;  %v1164_v27 = vld [vmem:[%s2196_s6 + $0x40] sm:$0xff]  ;;  %v1163_v28 = vld [vmem:[%s2196_s6 + $0x38] sm:$0xff] }
 0x356   : > { %1575 = vmatprep.subr.mxu0 %v1821_v11  ;;  %v1162_v29 = vld [vmem:[%s2196_s6 + $0x30] sm:$0xff]  ;;  %v1161_v30 = vld [vmem:[%s2196_s6 + $0x28] sm:$0xff]  ;;  %v1160_v31 = vld [vmem:[%s2196_s6 + $0x20] sm:$0xff] }
 0x357   : > { %1576 = vmatpush3.msra.mxu0 %v1170_v12  ;;  %v1159_v32 = vld [vmem:[%s2196_s6 + $0x18] sm:$0xff]  ;;  %v1158_v33 = vld [vmem:[%s2196_s6 + $0x10] sm:$0xff]  ;;  %v1157_v34 = vld [vmem:[%s2196_s6 + $0x8] sm:$0xff] }
 0x358   : > { %1577 = vmatprep.subr.mxu0 %v1821_v11  ;;  %v1156_v35 = vld [vmem:[%s2196_s6] sm:$0xff] }
 0x359   : > { %1578 = vmatpush3.msra.mxu0 %v1169_v15  ;;  %v1155_v36 = vld [vmem:[#allocation3] sm:$0xff] }
 0x35a   : > { %1579 = vmatprep.subr.mxu0 %v1821_v11  ;;  %v1409_v37 = vld [vmem:[%s2197_s7] ss:$0 sm:$0xff] }
 0x35b   : > { %1580 = vmatpush3.msra.mxu0 %v1168_v20 }
 0x35c   : > { %1581 = vmatprep.subr.mxu0 %v1821_v11 }
 0x35d   : > { %1582 = vmatpush3.msra.mxu0 %v1167_v21 }
 0x35e   : > { %1583 = vmatprep.subr.mxu0 %v1821_v11 }
 0x35f   : > { %1584 = vmatpush3.msra.mxu0 %v1166_v24 }
 0x360   : > { %1585 = vmatprep.subr.mxu0 %v1821_v11 }
 0x361   : > { %1586 = vmatpush3.msra.mxu0 %v1165_v26 }
 0x362   : > { %1587 = vmatprep.subr.mxu0 %v1821_v11 }
 0x363   : > { %1588 = vmatpush3.msra.mxu0 %v1164_v27 }
 0x364   : > { %1589 = vmatprep.subr.mxu0 %v1821_v11 }
 0x365   : > { %1590 = vmatpush3.msra.mxu0 %v1163_v28 }
 0x366   : > { %1591 = vmatprep.subr.mxu0 %v1821_v11 }
 0x367   : > { %1592 = vmatpush3.msra.mxu0 %v1162_v29 }
 0x368   : > { %1593 = vmatprep.subr.mxu0 %v1821_v11 }
 0x369   : > { %1594 = vmatpush3.msra.mxu0 %v1161_v30 }
 0x36a   : > { %1595 = vmatprep.subr.mxu0 %v1821_v11 }
 0x36b   : > { %1596 = vmatpush3.msra.mxu0 %v1160_v31 }
 0x36c   : > { %1597 = vmatprep.subr.mxu0 %v1821_v11 }
 0x36d   : > { %1598 = vmatpush3.msra.mxu0 %v1159_v32 }
 0x36e   : > { %1599 = vmatprep.subr.mxu0 %v1821_v11 }
 0x36f   : > { %1600 = vmatpush3.msra.mxu0 %v1158_v33 }
 0x370   : > { %1601 = vmatprep.subr.mxu0 %v1821_v11 }
 0x371   : > { %1602 = vmatpush3.msra.mxu0 %v1157_v34 }
 0x372   : > { %1603 = vmatprep.subr.mxu0 %v1821_v11 }
 0x373   : > { %1604 = vmatpush3.msra.mxu0 %v1156_v35 }
 0x374   : > { %1606 = vmatmul.mubr.f32.vlgmr.msra.gmra.mxu0 %v1155_v36 }
 0x434   : > { %v1245_v38 = vpop.f32.mrf.mxu0 }
 0x435   : > { %v1246_v39 = vadd.f32 %v1409_v37, %v1245_v38 }
 0x436   : > { %v1607_v40 = vpop.f32.mrf.mxu0 }
 0x437   : > { %1249 = vst [vmem:[#allocation5] sm:$0xff] %v1246_v39 }
 0x438 PF: > { %s2205_s20 = sadd.s32 4294967295, %s1815_s11   ;;  %s1823_s17 = smov [#allocation5]  }
 0x439   : > { %p2154_p7 = scmp.eq.s32.totalorder %s2205_s20, 3  ;;  %s1257_s22 = sshll.u32 %s1823_s17, 4  ;;  %s1258_s22 = int_to_ptr.vmem [resolvable:$true] %s1257_s22 }
 0x43a   : > { %s1733_s18 = scalar_lea.vmem %s1258_s22, 128  ;;  %p1740_p11 = scmp.lt.s32.totalorder %s1258_s22, %s1258_s22 }
 0x43b   : > { %p1734_p8 = scmp.ne.s32.totalorder %s1258_s22, %s1733_s18  ;;  %p1741_p12 = scmp.lt.s32.totalorder %s1733_s18, %s1733_s18 }
 0x43d   : > { %p1735_p9 = pnand %p1734_p8, %p2154_p7  ;;  %p1742_p13 = por %p1741_p12, %p1740_p11 }
 0x43f   : > { %p1736_p10 = pneg %p1735_p9 }
 0x441   : > { %p1743_p0 = pnand %p1742_p13, %p1736_p10 }
 0x443   : > { %1746 = shalt.err (!%p1743_p0)
}
 0x444   : > { %1625 = dma.vmem_to_hbm [thread:$0]  (%p2154_p7), %s1258_s22, 128, %s2198_s8, [#allocation6]  }
 0x445   : > { %1786 = dma.done.wait (%p2154_p7), [#allocation6], 128  }
 0x446   : > { %1788 = vsyncadd (%p2154_p7), [#allocation6], 4294967168 }
 0x447 PF: > { %s19_s11 = sadd.s32 1, %s1815_s11   ;;  %s2207_s25 = sld [smem:[#allocation8_spill]] }
 0x448   : > { %p16_p1 = scmp.ge.s32.totalorder %s19_s11, 6   ;;  %s2208_s26 = sld [smem:[#allocation9_spill]] }
 0x449   : > { %s2209_s27 = smov %s1795_s28  ;;  %s2210_s28 = smov %s1921_s19 }
 0x44a   : > { %s2211_s29 = smov %s1807_s9  ;;  %s2212_s30 = smov %s1811_s10 }
 0x44b   :  { %18 = sbr.rel (!%p16_p1) target bundleno = 6 (0x6), region = 150 }
 0x44d   : > { %s2213_s9 = smov %s2207_s25 }
 0x44e   : > { %s2214_s10 = smov %s2208_s26 }
 0x450   :  { %1270 = vsyncpa [#allocation6], 1 }
 0x451   :  { %1272 = vsyncpa [#allocation6 + $0x1], 1 }

</bundles_post_ra>
